<compile_context>
chip_gen: v7x
topology: tpu7x:2x2x1
jax: 0.10.0
libtpu: 0.0.40
codegen_flags: <defaults>
</compile_context>

<pallas_src>
from functools import partial

import numpy as np
import jax
import jax.numpy as jnp
from jax.experimental import pallas as pl
from jax.experimental.pallas import tpu as pltpu

NEG_SLOPE = 0.2   # dgl.GATConv default negative_slope


# --------------------------------------------------------------------------------------------
# Kernel
# --------------------------------------------------------------------------------------------
def _gat_layer(heads_in, w_ref, proj_ref, bias_ref, *,
               adj_t, ones_row, num_heads, hidden_dim, feat_pad):
    """One GATConv layer. heads_in: list of per-input-head (N, F_in) fp32 slabs.
    Returns a list of per-output-head (N, Fp) fp32 slabs (bias added, lane-padded)."""
    H, F, Fp = num_heads, hidden_dim, feat_pad

    # (1) Feature projection: one MXU matmul per input head (host-reshaped weights), summed.
    #     No head concatenation, no lane shuffles.
    z = jnp.dot(heads_in[0].astype(jnp.bfloat16), w_ref[0],
                preferred_element_type=jnp.float32)                        # (N, H*Fp) fp32
    for hi in range(1, len(heads_in)):
        z = z + jnp.dot(heads_in[hi].astype(jnp.bfloat16), w_ref[hi],
                        preferred_element_type=jnp.float32)

    # (2) Inject the exact 1.0 "denominator column" (lane F of each head's 128-lane block).
    #     Those z columns are exactly zero (their weight columns are zero padding), so the add
    #     is exact and the aggregation matmul below yields the softmax row-sum for free.
    z = z + ones_row
    zb = z.astype(jnp.bfloat16)

    # (3) Attention logits for ALL heads via one MXU matmul against the block-diag projection:
    #     scores[:, :H] = el (source term), scores[:, H:] = er (destination term).
    scores = jnp.dot(zb, proj_ref[...], preferred_element_type=jnp.float32)  # (N, 2H) fp32

    outs = []
    for ho in range(H):                                   # static unroll, H is tiny
        el_col = scores[:, ho:ho + 1]                     # (N, 1) source term
        er_col = scores[:, H + ho:H + ho + 1]             # (N, 1) destination term
        el_row = jnp.transpose(el_col)                    # (1, N) source term on lanes (O(N))

        # 1-D softmax shift (no O(N^2) row-max): LeakyReLU is monotone, so
        #   max_u LReLU(er[v] + el[u]) == LReLU(er[v] + max_u el[u]).
        el_max = jnp.max(el_col, axis=0, keepdims=True)   # (1, 1)
        shift = er_col + el_max
        e_max = jnp.maximum(shift, NEG_SLOPE * shift)     # (N, 1)

        # Logits + LeakyReLU (select-free) + exp (EUP, fp32) ; mask after exp with the bf16
        # 0/1 adjacency (exact).  Non-edge probabilities become exactly 0.
        e = er_col + el_row                               # (N, N): e[v, u]
        e = jnp.maximum(e, NEG_SLOPE * e)
        p = jnp.exp(e - e_max).astype(jnp.bfloat16) * adj_t           # (N, N) bf16

        # Aggregate with one MXU matmul; the folded ones column gives the denominator, and the
        # normalization happens on the O(N*Fp) result via an EUP approx reciprocal.
        zh = zb[:, ho * Fp:(ho + 1) * Fp]                              # aligned 128-lane slice
        agg = jnp.dot(p, zh, preferred_element_type=jnp.float32)       # (N, Fp) fp32
        denom = agg[:, F:F + 1]                                        # folded row-sum
        inv = pl.reciprocal(jnp.maximum(denom, 1e-9), approx=True)     # EUP slot
        outs.append(agg * inv + bias_ref[ho])                          # (N, Fp)
    return outs


def gat_kernel(x_ref, adjt_ref, seg_ref, ones_ref,
               w1_ref, p1_ref, b1_ref,
               w2_ref, p2_ref, b2_ref,
               w3_ref, p3_ref, b3_ref,
               out_ref, *, num_heads, hidden_dim, feat_pad):
    adj_t = adjt_ref[...]        # (N, N) bf16, resident once, reused by all three layers
    ones_row = ones_ref[...]     # (1, H*Fp) fp32 denominator one-hot

    layer = partial(_gat_layer, adj_t=adj_t, ones_row=ones_row,
                    num_heads=num_heads, hidden_dim=hidden_dim, feat_pad=feat_pad)

    h1 = layer([x_ref[...]], w1_ref, p1_ref, b1_ref)   # conv1(g, x).flatten(1)
    h2 = layer(h1, w2_ref, p2_ref, b2_ref)             # conv2(g, x).flatten(1)
    h3 = layer(h2, w3_ref, p3_ref, b3_ref)             # conv3(g, x)

    hmean = sum(h3) * (1.0 / num_heads)                # .mean(1) over heads -> (N, Fp)

    # dgl.mean_nodes per graph: seg rows hold 1/|V_g| (zero-padded to a sublane multiple).
    out_ref[...] = jnp.dot(seg_ref[...], hmean, preferred_element_type=jnp.float32)


# --------------------------------------------------------------------------------------------
# Host-side parameter prep (padding / reshaping is done once, off the kernel's critical path)
# --------------------------------------------------------------------------------------------
def _prep_layer(params, *, in_heads, in_feats, num_heads, hidden_dim, feat_pad):
    """Reshape+pad GATConv params.  Returns (W_r bf16 (H_in,F_in_rows,H*Fp),
    block-diag attention projection bf16 (H*Fp, 2H), bias fp32 (H, 1, Fp))."""
    W, al, ar, b = (np.asarray(p, np.float32) for p in params)
    H, F, Fp = num_heads, hidden_dim, feat_pad
    K = H * Fp
    in_rows = in_feats if in_heads == 1 else Fp        # hidden layers consume padded heads
    Wr = np.zeros((in_heads, in_rows, K), np.float32)
    proj = np.zeros((K, 2 * H), np.float32)
    bias = np.zeros((H, 1, Fp), np.float32)
    b_hf = b.reshape(H, F)
    for ho in range(H):
        for hi in range(in_heads):
            Wr[hi, :in_feats, ho * Fp:ho * Fp + F] = \
                W[hi * in_feats:(hi + 1) * in_feats, ho * F:(ho + 1) * F]
        proj[ho * Fp:ho * Fp + F, ho] = al[ho]          # el (source) term
        proj[ho * Fp:ho * Fp + F, H + ho] = ar[ho]      # er (destination) term
        bias[ho, 0, :F] = b_hf[ho]
    return (jnp.asarray(Wr, jnp.bfloat16), jnp.asarray(proj, jnp.bfloat16),
            jnp.asarray(bias, jnp.float32))


def gat_model_forward(x, adj_t, seg, params1, params2, params3, *, num_heads, hidden_dim):
    x_np = np.asarray(x, np.float32)
    adj_np = np.asarray(adj_t, np.float32)
    seg_np = np.asarray(seg, np.float32)
    N, input_dim = x_np.shape
    G = seg_np.shape[0]
    H, F = num_heads, hidden_dim

    Fp = int(np.ceil(F / 128)) * 128                   # pad per-head features to full vregs
    Gp = max(8, int(np.ceil(G / 8)) * 8)               # pad readout rows to a sublane multiple
    K = H * Fp

    l1 = _prep_layer(params1, in_heads=1, in_feats=input_dim,
                     num_heads=H, hidden_dim=F, feat_pad=Fp)
    l2 = _prep_layer(params2, in_heads=H, in_feats=F,
                     num_heads=H, hidden_dim=F, feat_pad=Fp)
    l3 = _prep_layer(params3, in_heads=H, in_feats=F,
                     num_heads=H, hidden_dim=F, feat_pad=Fp)

    ones_row = np.zeros((1, K), np.float32)            # denominator one-hot columns
    ones_row[0, np.arange(H) * Fp + F] = 1.0
    seg_pad = np.zeros((Gp, N), np.float32)
    seg_pad[:G] = seg_np

    inputs = [jnp.asarray(x_np), jnp.asarray(adj_np, jnp.bfloat16),   # 0/1 adjacency exact in bf16
              jnp.asarray(seg_pad), jnp.asarray(ones_row), *l1, *l2, *l3]

    # Advisory cost estimate for XLA's scheduler.
    flops = (2 * N * input_dim * K + 2 * 2 * N * K * K       # feature projections (3 layers)
             + 3 * 2 * N * K * (2 * H)                       # attention-logit matmuls
             + 3 * 2 * H * N * N * Fp                        # edge-softmax aggregations
             + 2 * Gp * N * Fp)                              # per-graph mean readout
    in_bytes = sum(int(np.prod(a.shape)) * a.dtype.itemsize for a in inputs)
    out_bytes = Gp * Fp * 4
    cost = pl.CostEstimate(flops=int(flops), transcendentals=int(3 * H * N * N),
                           bytes_accessed=int(in_bytes + out_bytes))

    # Scoped-VMEM sized to the resident working set (v5e default is only 16 MiB).
    working_set = (in_bytes + out_bytes
                   + N * N * (4 + 2)                 # one head's fp32 logits + bf16 probs
                   + (2 * H + 2) * N * Fp * 4)       # layer activations + z
    vmem_limit = int(min(64 << 20, max(32 << 20, 2 * working_set)))

    # No grid: single invocation, every operand resident in VMEM exactly once (no double-buffer,
    # no pipeline-step overhead) — optimal at this size; see TODO(synk) header for realistic N.
    vmem = pl.BlockSpec(memory_space=pltpu.MemorySpace.VMEM)
    out = pl.pallas_call(
        partial(gat_kernel, num_heads=H, hidden_dim=F, feat_pad=Fp),
        out_shape=jax.ShapeDtypeStruct((Gp, Fp), jnp.float32),
        in_specs=[vmem] * len(inputs),
        out_specs=vmem,
        compiler_params=pltpu.CompilerParams(vmem_limit_bytes=vmem_limit),
        cost_estimate=cost,
    )(*inputs)

    # torch.stack([dgl.mean_nodes(g_i, 'h')]) -> (G, 1, hidden_dim); strip padding host-side.
    return out[:G, :F].reshape(G, 1, F)


# --------------------------------------------------------------------------------------------
# Reference + demo
# --------------------------------------------------------------------------------------------
def gat_reference(x, adj_t, seg, params_list, num_heads, hidden_dim):
    """Pure-JAX fp32 reference with exact dgl.GATConv semantics (masked edge softmax)."""
    H, F = num_heads, hidden_dim
    mask = adj_t > 0                                     # mask[v, u] = edge u -> v
    h = x
    for li, (W, al, ar, b) in enumerate(params_list):
        z = h @ W
        zh = z.reshape(-1, H, F)
        el = jnp.einsum('uhf,hf->uh', zh, al)
        er = jnp.einsum('vhf,hf->vh', zh, ar)
        e = er[:, None, :] + el[None, :, :]              # (Nv, Nu, H)
        e = jnp.where(e > 0, e, NEG_SLOPE * e)
        e = jnp.where(mask[:, :, None], e, -jnp.inf)
        e = e - jnp.max(e, axis=1, keepdims=True)
        p = jnp.where(mask[:, :, None], jnp.exp(e), 0.0)
        p = p / jnp.sum(p, axis=1, keepdims=True)
        out = jnp.einsum('vuh,uhf->vhf', p, zh) + b.reshape(1, H, F)
        h = out.reshape(-1, H * F) if li < 2 else out.mean(axis=1)
    return seg @ h                                       # (G, F)


def init_gat_layer_params(key, in_dim, out_dim, heads):
    k1, k2, k3 = jax.random.split(key, 3)
    W = jax.random.normal(k1, (in_dim, heads * out_dim), jnp.float32) / jnp.sqrt(float(in_dim))
    al = 0.1 * jax.random.normal(k2, (heads, out_dim), jnp.float32)
    ar = 0.1 * jax.random.normal(k3, (heads, out_dim), jnp.float32)
    b = jnp.zeros((1, heads * out_dim), jnp.float32)     # dgl GATConv bias, zero-init
    return (W, al, ar, b)


if __name__ == "__main__":
    key = jax.random.PRNGKey(0)
    num_graphs, nodes_per_graph = 2, 8
    N = num_graphs * nodes_per_graph
    input_dim, hidden_dim, num_heads = 8, 8, 2

    # Batched graph: 2 ring graphs of 8 nodes each, plus self-loops (no zero in-degree nodes).
    A = np.zeros((N, N), dtype=np.float32)               # A[u, v] = 1 iff edge u -> v
    for g in range(num_graphs):
        base = g * nodes_per_graph
        for i in range(nodes_per_graph):
            u = base + i
            A[u, u] = 1.0                                 # self loop
            A[u, base + (i + 1) % nodes_per_graph] = 1.0  # ring edge
    adj_t = A.T                                           # adj_t[v, u]

    # Readout matrix (mean over nodes of each graph).
    S = np.zeros((num_graphs, N), dtype=np.float32)
    for g in range(num_graphs):
        S[g, g * nodes_per_graph:(g + 1) * nodes_per_graph] = 1.0 / nodes_per_graph

    kx, k1, k2, k3 = jax.random.split(key, 4)
    x = jax.random.normal(kx, (N, input_dim), jnp.float32)
    params1 = init_gat_layer_params(k1, input_dim, hidden_dim, num_heads)
    params2 = init_gat_layer_params(k2, hidden_dim * num_heads, hidden_dim, num_heads)
    params3 = init_gat_layer_params(k3, hidden_dim * num_heads, hidden_dim, num_heads)

    out = gat_model_forward(x, adj_t, S, params1, params2, params3,
                            num_heads=num_heads, hidden_dim=hidden_dim)
    out = jax.block_until_ready(out)
    assert out.shape == (num_graphs, 1, hidden_dim)
    assert bool(jnp.all(jnp.isfinite(out)))

    # Loose parity vs. fp32 reference (bf16 MXU operands + approx reciprocal ~1e-2 relative).
    ref = gat_reference(x, jnp.asarray(adj_t), jnp.asarray(S),
                        [params1, params2, params3], num_heads, hidden_dim)
    max_err = float(jnp.max(jnp.abs(out[:, 0, :] - ref)))
    assert max_err < 0.1, f"kernel deviates from reference: max_err={max_err}"

    print("KERNEL_OK")
</pallas_src>

<mosaic_0001>
module attributes {stable_mosaic.version = 11 : i64} {
  func.func @gat_kernel(%arg0: memref<16x8xf32, #tpu.memory_space<vmem>>, %arg1: memref<16x16xbf16, #tpu.memory_space<vmem>>, %arg2: memref<8x16xf32, #tpu.memory_space<vmem>>, %arg3: memref<1x256xf32, #tpu.memory_space<vmem>>, %arg4: memref<1x8x256xbf16, #tpu.memory_space<vmem>>, %arg5: memref<256x4xbf16, #tpu.memory_space<vmem>>, %arg6: memref<2x1x128xf32, #tpu.memory_space<vmem>>, %arg7: memref<2x128x256xbf16, #tpu.memory_space<vmem>>, %arg8: memref<256x4xbf16, #tpu.memory_space<vmem>>, %arg9: memref<2x1x128xf32, #tpu.memory_space<vmem>>, %arg10: memref<2x128x256xbf16, #tpu.memory_space<vmem>>, %arg11: memref<256x4xbf16, #tpu.memory_space<vmem>>, %arg12: memref<2x1x128xf32, #tpu.memory_space<vmem>>, %arg13: memref<8x128xf32, #tpu.memory_space<vmem>>) attributes {dimension_semantics = [], scalar_prefetch = 0 : i64, scratch_operands = 0 : i64, tpu.core_type = #tpu.core_type<tc>} {
    %c0 = arith.constant 0 : index
    %c0_0 = arith.constant 0 : index
    %0 = vector.load %arg1[%c0, %c0_0] : memref<16x16xbf16, #tpu.memory_space<vmem>>, vector<16x16xbf16>
    %c0_1 = arith.constant 0 : index
    %c0_2 = arith.constant 0 : index
    %1 = vector.load %arg3[%c0_1, %c0_2] : memref<1x256xf32, #tpu.memory_space<vmem>>, vector<1x256xf32>
    %c0_3 = arith.constant 0 : index
    %c0_4 = arith.constant 0 : index
    %2 = vector.load %arg0[%c0_3, %c0_4] : memref<16x8xf32, #tpu.memory_space<vmem>>, vector<16x8xf32>
    %3 = arith.truncf %2 : vector<16x8xf32> to vector<16x8xbf16>
    %c0_5 = arith.constant 0 : index
    %c0_6 = arith.constant 0 : index
    %c0_7 = arith.constant 0 : index
    %4 = vector.load %arg4[%c0_5, %c0_6, %c0_7] : memref<1x8x256xbf16, #tpu.memory_space<vmem>>, vector<1x8x256xbf16>
    %5 = vector.shape_cast %4 : vector<1x8x256xbf16> to vector<8x256xbf16>
    %cst = arith.constant dense<0.000000e+00> : vector<16x256xf32>
    %6 = tpu.matmul %3, %5, %cst {dimension_numbers = #tpu.dot_dimension_numbers<[1], [0], [0], [1], [0, 0, 1, 1], [], []>} : vector<16x8xbf16>, vector<8x256xbf16>, vector<16x256xf32> -> vector<16x256xf32>
    %7 = vector.broadcast %1 : vector<1x256xf32> to vector<16x256xf32>
    %8 = arith.addf %6, %7 : vector<16x256xf32>
    %9 = arith.truncf %8 : vector<16x256xf32> to vector<16x256xbf16>
    %c0_8 = arith.constant 0 : index
    %c0_9 = arith.constant 0 : index
    %10 = vector.load %arg5[%c0_8, %c0_9] : memref<256x4xbf16, #tpu.memory_space<vmem>>, vector<256x4xbf16>
    %cst_10 = arith.constant dense<0.000000e+00> : vector<16x4xf32>
    %11 = tpu.matmul %9, %10, %cst_10 {dimension_numbers = #tpu.dot_dimension_numbers<[1], [0], [0], [1], [0, 0, 1, 1], [], []>} : vector<16x256xbf16>, vector<256x4xbf16>, vector<16x4xf32> -> vector<16x4xf32>
    %12 = vector.extract_strided_slice %11 {offsets = [0, 0], sizes = [16, 1], strides = [1, 1]} : vector<16x4xf32> to vector<16x1xf32>
    %13 = vector.extract_strided_slice %11 {offsets = [0, 2], sizes = [16, 1], strides = [1, 1]} : vector<16x4xf32> to vector<16x1xf32>
    %14 = tpu.transpose %12, [1, 0] : vector<16x1xf32> -> vector<1x16xf32>
    %cst_11 = arith.constant dense<0xFF800000> : vector<1xf32>
    %15 = vector.multi_reduction <maximumf>, %12, %cst_11 [0] : vector<16x1xf32> to vector<1xf32>
    %16 = vector.shape_cast %15 : vector<1xf32> to vector<1x1xf32>
    %17 = vector.broadcast %16 : vector<1x1xf32> to vector<16x1xf32>
    %18 = arith.addf %13, %17 : vector<16x1xf32>
    %cst_12 = arith.constant 2.000000e-01 : f32
    %19 = vector.broadcast %cst_12 : f32 to vector<16x1xf32>
    %20 = arith.mulf %19, %18 : vector<16x1xf32>
    %21 = arith.maximumf %18, %20 : vector<16x1xf32>
    %22 = vector.broadcast %13 : vector<16x1xf32> to vector<16x16xf32>
    %23 = vector.broadcast %14 : vector<1x16xf32> to vector<16x16xf32>
    %24 = arith.addf %22, %23 : vector<16x16xf32>
    %cst_13 = arith.constant 2.000000e-01 : f32
    %25 = vector.broadcast %cst_13 : f32 to vector<16x16xf32>
    %26 = arith.mulf %25, %24 : vector<16x16xf32>
    %27 = arith.maximumf %24, %26 : vector<16x16xf32>
    %28 = vector.broadcast %21 : vector<16x1xf32> to vector<16x16xf32>
    %29 = arith.subf %27, %28 : vector<16x16xf32>
    %30 = math.exp %29 : vector<16x16xf32>
    %31 = arith.truncf %30 : vector<16x16xf32> to vector<16x16xbf16>
    %32 = arith.mulf %31, %0 : vector<16x16xbf16>
    %33 = vector.extract_strided_slice %9 {offsets = [0, 0], sizes = [16, 128], strides = [1, 1]} : vector<16x256xbf16> to vector<16x128xbf16>
    %cst_14 = arith.constant dense<0.000000e+00> : vector<16x128xf32>
    %34 = tpu.matmul %32, %33, %cst_14 {dimension_numbers = #tpu.dot_dimension_numbers<[1], [0], [0], [1], [0, 0, 1, 1], [], []>} : vector<16x16xbf16>, vector<16x128xbf16>, vector<16x128xf32> -> vector<16x128xf32>
    %35 = vector.extract_strided_slice %34 {offsets = [0, 8], sizes = [16, 1], strides = [1, 1]} : vector<16x128xf32> to vector<16x1xf32>
    %cst_15 = arith.constant 9.99999971E-10 : f32
    %36 = vector.broadcast %cst_15 : f32 to vector<16x1xf32>
    %37 = arith.maximumf %35, %36 : vector<16x1xf32>
    %38 = tpu.reciprocal %37 {approx = true} : vector<16x1xf32> -> vector<16x1xf32>
    %39 = vector.broadcast %38 : vector<16x1xf32> to vector<16x128xf32>
    %40 = arith.mulf %34, %39 : vector<16x128xf32>
    %c0_16 = arith.constant 0 : index
    %c0_17 = arith.constant 0 : index
    %c0_18 = arith.constant 0 : index
    %41 = vector.load %arg6[%c0_16, %c0_17, %c0_18] : memref<2x1x128xf32, #tpu.memory_space<vmem>>, vector<1x1x128xf32>
    %42 = vector.shape_cast %41 : vector<1x1x128xf32> to vector<1x128xf32>
    %43 = vector.broadcast %42 : vector<1x128xf32> to vector<16x128xf32>
    %44 = arith.addf %40, %43 : vector<16x128xf32>
    %45 = vector.extract_strided_slice %11 {offsets = [0, 1], sizes = [16, 1], strides = [1, 1]} : vector<16x4xf32> to vector<16x1xf32>
    %46 = vector.extract_strided_slice %11 {offsets = [0, 3], sizes = [16, 1], strides = [1, 1]} : vector<16x4xf32> to vector<16x1xf32>
    %47 = tpu.transpose %45, [1, 0] : vector<16x1xf32> -> vector<1x16xf32>
    %cst_19 = arith.constant dense<0xFF800000> : vector<1xf32>
    %48 = vector.multi_reduction <maximumf>, %45, %cst_19 [0] : vector<16x1xf32> to vector<1xf32>
    %49 = vector.shape_cast %48 : vector<1xf32> to vector<1x1xf32>
    %50 = vector.broadcast %49 : vector<1x1xf32> to vector<16x1xf32>
    %51 = arith.addf %46, %50 : vector<16x1xf32>
    %cst_20 = arith.constant 2.000000e-01 : f32
    %52 = vector.broadcast %cst_20 : f32 to vector<16x1xf32>
    %53 = arith.mulf %52, %51 : vector<16x1xf32>
    %54 = arith.maximumf %51, %53 : vector<16x1xf32>
    %55 = vector.broadcast %46 : vector<16x1xf32> to vector<16x16xf32>
    %56 = vector.broadcast %47 : vector<1x16xf32> to vector<16x16xf32>
    %57 = arith.addf %55, %56 : vector<16x16xf32>
    %cst_21 = arith.constant 2.000000e-01 : f32
    %58 = vector.broadcast %cst_21 : f32 to vector<16x16xf32>
    %59 = arith.mulf %58, %57 : vector<16x16xf32>
    %60 = arith.maximumf %57, %59 : vector<16x16xf32>
    %61 = vector.broadcast %54 : vector<16x1xf32> to vector<16x16xf32>
    %62 = arith.subf %60, %61 : vector<16x16xf32>
    %63 = math.exp %62 : vector<16x16xf32>
    %64 = arith.truncf %63 : vector<16x16xf32> to vector<16x16xbf16>
    %65 = arith.mulf %64, %0 : vector<16x16xbf16>
    %66 = vector.extract_strided_slice %9 {offsets = [0, 128], sizes = [16, 128], strides = [1, 1]} : vector<16x256xbf16> to vector<16x128xbf16>
    %cst_22 = arith.constant dense<0.000000e+00> : vector<16x128xf32>
    %67 = tpu.matmul %65, %66, %cst_22 {dimension_numbers = #tpu.dot_dimension_numbers<[1], [0], [0], [1], [0, 0, 1, 1], [], []>} : vector<16x16xbf16>, vector<16x128xbf16>, vector<16x128xf32> -> vector<16x128xf32>
    %68 = vector.extract_strided_slice %67 {offsets = [0, 8], sizes = [16, 1], strides = [1, 1]} : vector<16x128xf32> to vector<16x1xf32>
    %cst_23 = arith.constant 9.99999971E-10 : f32
    %69 = vector.broadcast %cst_23 : f32 to vector<16x1xf32>
    %70 = arith.maximumf %68, %69 : vector<16x1xf32>
    %71 = tpu.reciprocal %70 {approx = true} : vector<16x1xf32> -> vector<16x1xf32>
    %72 = vector.broadcast %71 : vector<16x1xf32> to vector<16x128xf32>
    %73 = arith.mulf %67, %72 : vector<16x128xf32>
    %c1 = arith.constant 1 : index
    %c0_24 = arith.constant 0 : index
    %c0_25 = arith.constant 0 : index
    %74 = vector.load %arg6[%c1, %c0_24, %c0_25] : memref<2x1x128xf32, #tpu.memory_space<vmem>>, vector<1x1x128xf32>
    %75 = vector.shape_cast %74 : vector<1x1x128xf32> to vector<1x128xf32>
    %76 = vector.broadcast %75 : vector<1x128xf32> to vector<16x128xf32>
    %77 = arith.addf %73, %76 : vector<16x128xf32>
    %78 = arith.truncf %44 : vector<16x128xf32> to vector<16x128xbf16>
    %c0_26 = arith.constant 0 : index
    %c0_27 = arith.constant 0 : index
    %c0_28 = arith.constant 0 : index
    %79 = vector.load %arg7[%c0_26, %c0_27, %c0_28] : memref<2x128x256xbf16, #tpu.memory_space<vmem>>, vector<1x128x256xbf16>
    %80 = vector.shape_cast %79 : vector<1x128x256xbf16> to vector<128x256xbf16>
    %cst_29 = arith.constant dense<0.000000e+00> : vector<16x256xf32>
    %81 = tpu.matmul %78, %80, %cst_29 {dimension_numbers = #tpu.dot_dimension_numbers<[1], [0], [0], [1], [0, 0, 1, 1], [], []>} : vector<16x128xbf16>, vector<128x256xbf16>, vector<16x256xf32> -> vector<16x256xf32>
    %82 = arith.truncf %77 : vector<16x128xf32> to vector<16x128xbf16>
    %c1_30 = arith.constant 1 : index
    %c0_31 = arith.constant 0 : index
    %c0_32 = arith.constant 0 : index
    %83 = vector.load %arg7[%c1_30, %c0_31, %c0_32] : memref<2x128x256xbf16, #tpu.memory_space<vmem>>, vector<1x128x256xbf16>
    %84 = vector.shape_cast %83 : vector<1x128x256xbf16> to vector<128x256xbf16>
    %cst_33 = arith.constant dense<0.000000e+00> : vector<16x256xf32>
    %85 = tpu.matmul %82, %84, %cst_33 {dimension_numbers = #tpu.dot_dimension_numbers<[1], [0], [0], [1], [0, 0, 1, 1], [], []>} : vector<16x128xbf16>, vector<128x256xbf16>, vector<16x256xf32> -> vector<16x256xf32>
    %86 = arith.addf %81, %85 : vector<16x256xf32>
    %87 = vector.broadcast %1 : vector<1x256xf32> to vector<16x256xf32>
    %88 = arith.addf %86, %87 : vector<16x256xf32>
    %89 = arith.truncf %88 : vector<16x256xf32> to vector<16x256xbf16>
    %c0_34 = arith.constant 0 : index
    %c0_35 = arith.constant 0 : index
    %90 = vector.load %arg8[%c0_34, %c0_35] : memref<256x4xbf16, #tpu.memory_space<vmem>>, vector<256x4xbf16>
    %cst_36 = arith.constant dense<0.000000e+00> : vector<16x4xf32>
    %91 = tpu.matmul %89, %90, %cst_36 {dimension_numbers = #tpu.dot_dimension_numbers<[1], [0], [0], [1], [0, 0, 1, 1], [], []>} : vector<16x256xbf16>, vector<256x4xbf16>, vector<16x4xf32> -> vector<16x4xf32>
    %92 = vector.extract_strided_slice %91 {offsets = [0, 0], sizes = [16, 1], strides = [1, 1]} : vector<16x4xf32> to vector<16x1xf32>
    %93 = vector.extract_strided_slice %91 {offsets = [0, 2], sizes = [16, 1], strides = [1, 1]} : vector<16x4xf32> to vector<16x1xf32>
    %94 = tpu.transpose %92, [1, 0] : vector<16x1xf32> -> vector<1x16xf32>
    %cst_37 = arith.constant dense<0xFF800000> : vector<1xf32>
    %95 = vector.multi_reduction <maximumf>, %92, %cst_37 [0] : vector<16x1xf32> to vector<1xf32>
    %96 = vector.shape_cast %95 : vector<1xf32> to vector<1x1xf32>
    %97 = vector.broadcast %96 : vector<1x1xf32> to vector<16x1xf32>
    %98 = arith.addf %93, %97 : vector<16x1xf32>
    %cst_38 = arith.constant 2.000000e-01 : f32
    %99 = vector.broadcast %cst_38 : f32 to vector<16x1xf32>
    %100 = arith.mulf %99, %98 : vector<16x1xf32>
    %101 = arith.maximumf %98, %100 : vector<16x1xf32>
    %102 = vector.broadcast %93 : vector<16x1xf32> to vector<16x16xf32>
    %103 = vector.broadcast %94 : vector<1x16xf32> to vector<16x16xf32>
    %104 = arith.addf %102, %103 : vector<16x16xf32>
    %cst_39 = arith.constant 2.000000e-01 : f32
    %105 = vector.broadcast %cst_39 : f32 to vector<16x16xf32>
    %106 = arith.mulf %105, %104 : vector<16x16xf32>
    %107 = arith.maximumf %104, %106 : vector<16x16xf32>
    %108 = vector.broadcast %101 : vector<16x1xf32> to vector<16x16xf32>
    %109 = arith.subf %107, %108 : vector<16x16xf32>
    %110 = math.exp %109 : vector<16x16xf32>
    %111 = arith.truncf %110 : vector<16x16xf32> to vector<16x16xbf16>
    %112 = arith.mulf %111, %0 : vector<16x16xbf16>
    %113 = vector.extract_strided_slice %89 {offsets = [0, 0], sizes = [16, 128], strides = [1, 1]} : vector<16x256xbf16> to vector<16x128xbf16>
    %cst_40 = arith.constant dense<0.000000e+00> : vector<16x128xf32>
    %114 = tpu.matmul %112, %113, %cst_40 {dimension_numbers = #tpu.dot_dimension_numbers<[1], [0], [0], [1], [0, 0, 1, 1], [], []>} : vector<16x16xbf16>, vector<16x128xbf16>, vector<16x128xf32> -> vector<16x128xf32>
    %115 = vector.extract_strided_slice %114 {offsets = [0, 8], sizes = [16, 1], strides = [1, 1]} : vector<16x128xf32> to vector<16x1xf32>
    %cst_41 = arith.constant 9.99999971E-10 : f32
    %116 = vector.broadcast %cst_41 : f32 to vector<16x1xf32>
    %117 = arith.maximumf %115, %116 : vector<16x1xf32>
    %118 = tpu.reciprocal %117 {approx = true} : vector<16x1xf32> -> vector<16x1xf32>
    %119 = vector.broadcast %118 : vector<16x1xf32> to vector<16x128xf32>
    %120 = arith.mulf %114, %119 : vector<16x128xf32>
    %c0_42 = arith.constant 0 : index
    %c0_43 = arith.constant 0 : index
    %c0_44 = arith.constant 0 : index
    %121 = vector.load %arg9[%c0_42, %c0_43, %c0_44] : memref<2x1x128xf32, #tpu.memory_space<vmem>>, vector<1x1x128xf32>
    %122 = vector.shape_cast %121 : vector<1x1x128xf32> to vector<1x128xf32>
    %123 = vector.broadcast %122 : vector<1x128xf32> to vector<16x128xf32>
    %124 = arith.addf %120, %123 : vector<16x128xf32>
    %125 = vector.extract_strided_slice %91 {offsets = [0, 1], sizes = [16, 1], strides = [1, 1]} : vector<16x4xf32> to vector<16x1xf32>
    %126 = vector.extract_strided_slice %91 {offsets = [0, 3], sizes = [16, 1], strides = [1, 1]} : vector<16x4xf32> to vector<16x1xf32>
    %127 = tpu.transpose %125, [1, 0] : vector<16x1xf32> -> vector<1x16xf32>
    %cst_45 = arith.constant dense<0xFF800000> : vector<1xf32>
    %128 = vector.multi_reduction <maximumf>, %125, %cst_45 [0] : vector<16x1xf32> to vector<1xf32>
    %129 = vector.shape_cast %128 : vector<1xf32> to vector<1x1xf32>
    %130 = vector.broadcast %129 : vector<1x1xf32> to vector<16x1xf32>
    %131 = arith.addf %126, %130 : vector<16x1xf32>
    %cst_46 = arith.constant 2.000000e-01 : f32
    %132 = vector.broadcast %cst_46 : f32 to vector<16x1xf32>
    %133 = arith.mulf %132, %131 : vector<16x1xf32>
    %134 = arith.maximumf %131, %133 : vector<16x1xf32>
    %135 = vector.broadcast %126 : vector<16x1xf32> to vector<16x16xf32>
    %136 = vector.broadcast %127 : vector<1x16xf32> to vector<16x16xf32>
    %137 = arith.addf %135, %136 : vector<16x16xf32>
    %cst_47 = arith.constant 2.000000e-01 : f32
    %138 = vector.broadcast %cst_47 : f32 to vector<16x16xf32>
    %139 = arith.mulf %138, %137 : vector<16x16xf32>
    %140 = arith.maximumf %137, %139 : vector<16x16xf32>
    %141 = vector.broadcast %134 : vector<16x1xf32> to vector<16x16xf32>
    %142 = arith.subf %140, %141 : vector<16x16xf32>
    %143 = math.exp %142 : vector<16x16xf32>
    %144 = arith.truncf %143 : vector<16x16xf32> to vector<16x16xbf16>
    %145 = arith.mulf %144, %0 : vector<16x16xbf16>
    %146 = vector.extract_strided_slice %89 {offsets = [0, 128], sizes = [16, 128], strides = [1, 1]} : vector<16x256xbf16> to vector<16x128xbf16>
    %cst_48 = arith.constant dense<0.000000e+00> : vector<16x128xf32>
    %147 = tpu.matmul %145, %146, %cst_48 {dimension_numbers = #tpu.dot_dimension_numbers<[1], [0], [0], [1], [0, 0, 1, 1], [], []>} : vector<16x16xbf16>, vector<16x128xbf16>, vector<16x128xf32> -> vector<16x128xf32>
    %148 = vector.extract_strided_slice %147 {offsets = [0, 8], sizes = [16, 1], strides = [1, 1]} : vector<16x128xf32> to vector<16x1xf32>
    %cst_49 = arith.constant 9.99999971E-10 : f32
    %149 = vector.broadcast %cst_49 : f32 to vector<16x1xf32>
    %150 = arith.maximumf %148, %149 : vector<16x1xf32>
    %151 = tpu.reciprocal %150 {approx = true} : vector<16x1xf32> -> vector<16x1xf32>
    %152 = vector.broadcast %151 : vector<16x1xf32> to vector<16x128xf32>
    %153 = arith.mulf %147, %152 : vector<16x128xf32>
    %c1_50 = arith.constant 1 : index
    %c0_51 = arith.constant 0 : index
    %c0_52 = arith.constant 0 : index
    %154 = vector.load %arg9[%c1_50, %c0_51, %c0_52] : memref<2x1x128xf32, #tpu.memory_space<vmem>>, vector<1x1x128xf32>
    %155 = vector.shape_cast %154 : vector<1x1x128xf32> to vector<1x128xf32>
    %156 = vector.broadcast %155 : vector<1x128xf32> to vector<16x128xf32>
    %157 = arith.addf %153, %156 : vector<16x128xf32>
    %158 = arith.truncf %124 : vector<16x128xf32> to vector<16x128xbf16>
    %c0_53 = arith.constant 0 : index
    %c0_54 = arith.constant 0 : index
    %c0_55 = arith.constant 0 : index
    %159 = vector.load %arg10[%c0_53, %c0_54, %c0_55] : memref<2x128x256xbf16, #tpu.memory_space<vmem>>, vector<1x128x256xbf16>
    %160 = vector.shape_cast %159 : vector<1x128x256xbf16> to vector<128x256xbf16>
    %cst_56 = arith.constant dense<0.000000e+00> : vector<16x256xf32>
    %161 = tpu.matmul %158, %160, %cst_56 {dimension_numbers = #tpu.dot_dimension_numbers<[1], [0], [0], [1], [0, 0, 1, 1], [], []>} : vector<16x128xbf16>, vector<128x256xbf16>, vector<16x256xf32> -> vector<16x256xf32>
    %162 = arith.truncf %157 : vector<16x128xf32> to vector<16x128xbf16>
    %c1_57 = arith.constant 1 : index
    %c0_58 = arith.constant 0 : index
    %c0_59 = arith.constant 0 : index
    %163 = vector.load %arg10[%c1_57, %c0_58, %c0_59] : memref<2x128x256xbf16, #tpu.memory_space<vmem>>, vector<1x128x256xbf16>
    %164 = vector.shape_cast %163 : vector<1x128x256xbf16> to vector<128x256xbf16>
    %cst_60 = arith.constant dense<0.000000e+00> : vector<16x256xf32>
    %165 = tpu.matmul %162, %164, %cst_60 {dimension_numbers = #tpu.dot_dimension_numbers<[1], [0], [0], [1], [0, 0, 1, 1], [], []>} : vector<16x128xbf16>, vector<128x256xbf16>, vector<16x256xf32> -> vector<16x256xf32>
    %166 = arith.addf %161, %165 : vector<16x256xf32>
    %167 = vector.broadcast %1 : vector<1x256xf32> to vector<16x256xf32>
    %168 = arith.addf %166, %167 : vector<16x256xf32>
    %169 = arith.truncf %168 : vector<16x256xf32> to vector<16x256xbf16>
    %c0_61 = arith.constant 0 : index
    %c0_62 = arith.constant 0 : index
    %170 = vector.load %arg11[%c0_61, %c0_62] : memref<256x4xbf16, #tpu.memory_space<vmem>>, vector<256x4xbf16>
    %cst_63 = arith.constant dense<0.000000e+00> : vector<16x4xf32>
    %171 = tpu.matmul %169, %170, %cst_63 {dimension_numbers = #tpu.dot_dimension_numbers<[1], [0], [0], [1], [0, 0, 1, 1], [], []>} : vector<16x256xbf16>, vector<256x4xbf16>, vector<16x4xf32> -> vector<16x4xf32>
    %172 = vector.extract_strided_slice %171 {offsets = [0, 0], sizes = [16, 1], strides = [1, 1]} : vector<16x4xf32> to vector<16x1xf32>
    %173 = vector.extract_strided_slice %171 {offsets = [0, 2], sizes = [16, 1], strides = [1, 1]} : vector<16x4xf32> to vector<16x1xf32>
    %174 = tpu.transpose %172, [1, 0] : vector<16x1xf32> -> vector<1x16xf32>
    %cst_64 = arith.constant dense<0xFF800000> : vector<1xf32>
    %175 = vector.multi_reduction <maximumf>, %172, %cst_64 [0] : vector<16x1xf32> to vector<1xf32>
    %176 = vector.shape_cast %175 : vector<1xf32> to vector<1x1xf32>
    %177 = vector.broadcast %176 : vector<1x1xf32> to vector<16x1xf32>
    %178 = arith.addf %173, %177 : vector<16x1xf32>
    %cst_65 = arith.constant 2.000000e-01 : f32
    %179 = vector.broadcast %cst_65 : f32 to vector<16x1xf32>
    %180 = arith.mulf %179, %178 : vector<16x1xf32>
    %181 = arith.maximumf %178, %180 : vector<16x1xf32>
    %182 = vector.broadcast %173 : vector<16x1xf32> to vector<16x16xf32>
    %183 = vector.broadcast %174 : vector<1x16xf32> to vector<16x16xf32>
    %184 = arith.addf %182, %183 : vector<16x16xf32>
    %cst_66 = arith.constant 2.000000e-01 : f32
    %185 = vector.broadcast %cst_66 : f32 to vector<16x16xf32>
    %186 = arith.mulf %185, %184 : vector<16x16xf32>
    %187 = arith.maximumf %184, %186 : vector<16x16xf32>
    %188 = vector.broadcast %181 : vector<16x1xf32> to vector<16x16xf32>
    %189 = arith.subf %187, %188 : vector<16x16xf32>
    %190 = math.exp %189 : vector<16x16xf32>
    %191 = arith.truncf %190 : vector<16x16xf32> to vector<16x16xbf16>
    %192 = arith.mulf %191, %0 : vector<16x16xbf16>
    %193 = vector.extract_strided_slice %169 {offsets = [0, 0], sizes = [16, 128], strides = [1, 1]} : vector<16x256xbf16> to vector<16x128xbf16>
    %cst_67 = arith.constant dense<0.000000e+00> : vector<16x128xf32>
    %194 = tpu.matmul %192, %193, %cst_67 {dimension_numbers = #tpu.dot_dimension_numbers<[1], [0], [0], [1], [0, 0, 1, 1], [], []>} : vector<16x16xbf16>, vector<16x128xbf16>, vector<16x128xf32> -> vector<16x128xf32>
    %195 = vector.extract_strided_slice %194 {offsets = [0, 8], sizes = [16, 1], strides = [1, 1]} : vector<16x128xf32> to vector<16x1xf32>
    %cst_68 = arith.constant 9.99999971E-10 : f32
    %196 = vector.broadcast %cst_68 : f32 to vector<16x1xf32>
    %197 = arith.maximumf %195, %196 : vector<16x1xf32>
    %198 = tpu.reciprocal %197 {approx = true} : vector<16x1xf32> -> vector<16x1xf32>
    %199 = vector.broadcast %198 : vector<16x1xf32> to vector<16x128xf32>
    %200 = arith.mulf %194, %199 : vector<16x128xf32>
    %c0_69 = arith.constant 0 : index
    %c0_70 = arith.constant 0 : index
    %c0_71 = arith.constant 0 : index
    %201 = vector.load %arg12[%c0_69, %c0_70, %c0_71] : memref<2x1x128xf32, #tpu.memory_space<vmem>>, vector<1x1x128xf32>
    %202 = vector.shape_cast %201 : vector<1x1x128xf32> to vector<1x128xf32>
    %203 = vector.broadcast %202 : vector<1x128xf32> to vector<16x128xf32>
    %204 = arith.addf %200, %203 : vector<16x128xf32>
    %205 = vector.extract_strided_slice %171 {offsets = [0, 1], sizes = [16, 1], strides = [1, 1]} : vector<16x4xf32> to vector<16x1xf32>
    %206 = vector.extract_strided_slice %171 {offsets = [0, 3], sizes = [16, 1], strides = [1, 1]} : vector<16x4xf32> to vector<16x1xf32>
    %207 = tpu.transpose %205, [1, 0] : vector<16x1xf32> -> vector<1x16xf32>
    %cst_72 = arith.constant dense<0xFF800000> : vector<1xf32>
    %208 = vector.multi_reduction <maximumf>, %205, %cst_72 [0] : vector<16x1xf32> to vector<1xf32>
    %209 = vector.shape_cast %208 : vector<1xf32> to vector<1x1xf32>
    %210 = vector.broadcast %209 : vector<1x1xf32> to vector<16x1xf32>
    %211 = arith.addf %206, %210 : vector<16x1xf32>
    %cst_73 = arith.constant 2.000000e-01 : f32
    %212 = vector.broadcast %cst_73 : f32 to vector<16x1xf32>
    %213 = arith.mulf %212, %211 : vector<16x1xf32>
    %214 = arith.maximumf %211, %213 : vector<16x1xf32>
    %215 = vector.broadcast %206 : vector<16x1xf32> to vector<16x16xf32>
    %216 = vector.broadcast %207 : vector<1x16xf32> to vector<16x16xf32>
    %217 = arith.addf %215, %216 : vector<16x16xf32>
    %cst_74 = arith.constant 2.000000e-01 : f32
    %218 = vector.broadcast %cst_74 : f32 to vector<16x16xf32>
    %219 = arith.mulf %218, %217 : vector<16x16xf32>
    %220 = arith.maximumf %217, %219 : vector<16x16xf32>
    %221 = vector.broadcast %214 : vector<16x1xf32> to vector<16x16xf32>
    %222 = arith.subf %220, %221 : vector<16x16xf32>
    %223 = math.exp %222 : vector<16x16xf32>
    %224 = arith.truncf %223 : vector<16x16xf32> to vector<16x16xbf16>
    %225 = arith.mulf %224, %0 : vector<16x16xbf16>
    %226 = vector.extract_strided_slice %169 {offsets = [0, 128], sizes = [16, 128], strides = [1, 1]} : vector<16x256xbf16> to vector<16x128xbf16>
    %cst_75 = arith.constant dense<0.000000e+00> : vector<16x128xf32>
    %227 = tpu.matmul %225, %226, %cst_75 {dimension_numbers = #tpu.dot_dimension_numbers<[1], [0], [0], [1], [0, 0, 1, 1], [], []>} : vector<16x16xbf16>, vector<16x128xbf16>, vector<16x128xf32> -> vector<16x128xf32>
    %228 = vector.extract_strided_slice %227 {offsets = [0, 8], sizes = [16, 1], strides = [1, 1]} : vector<16x128xf32> to vector<16x1xf32>
    %cst_76 = arith.constant 9.99999971E-10 : f32
    %229 = vector.broadcast %cst_76 : f32 to vector<16x1xf32>
    %230 = arith.maximumf %228, %229 : vector<16x1xf32>
    %231 = tpu.reciprocal %230 {approx = true} : vector<16x1xf32> -> vector<16x1xf32>
    %232 = vector.broadcast %231 : vector<16x1xf32> to vector<16x128xf32>
    %233 = arith.mulf %227, %232 : vector<16x128xf32>
    %c1_77 = arith.constant 1 : index
    %c0_78 = arith.constant 0 : index
    %c0_79 = arith.constant 0 : index
    %234 = vector.load %arg12[%c1_77, %c0_78, %c0_79] : memref<2x1x128xf32, #tpu.memory_space<vmem>>, vector<1x1x128xf32>
    %235 = vector.shape_cast %234 : vector<1x1x128xf32> to vector<1x128xf32>
    %236 = vector.broadcast %235 : vector<1x128xf32> to vector<16x128xf32>
    %237 = arith.addf %233, %236 : vector<16x128xf32>
    %cst_80 = arith.constant 0.000000e+00 : f32
    %238 = vector.broadcast %cst_80 : f32 to vector<16x128xf32>
    %239 = arith.addf %238, %204 : vector<16x128xf32>
    %240 = arith.addf %239, %237 : vector<16x128xf32>
    %cst_81 = arith.constant 5.000000e-01 : f32
    %241 = vector.broadcast %cst_81 : f32 to vector<16x128xf32>
    %242 = arith.mulf %240, %241 : vector<16x128xf32>
    %c0_82 = arith.constant 0 : index
    %c0_83 = arith.constant 0 : index
    %243 = vector.load %arg2[%c0_82, %c0_83] : memref<8x16xf32, #tpu.memory_space<vmem>>, vector<8x16xf32>
    %cst_84 = arith.constant dense<0.000000e+00> : vector<8x128xf32>
    %244 = tpu.matmul %243, %242, %cst_84 {dimension_numbers = #tpu.dot_dimension_numbers<[1], [0], [0], [1], [0, 0, 1, 1], [], []>} : vector<8x16xf32>, vector<16x128xf32>, vector<8x128xf32> -> vector<8x128xf32>
    %c0_85 = arith.constant 0 : index
    %c0_86 = arith.constant 0 : index
    %245 = vector.load %arg13[%c0_85, %c0_86] : memref<8x128xf32, #tpu.memory_space<vmem>>, vector<8x128xf32>
    tpu.vector_store %arg13[%c0_85, %c0_86], %244 {strides = array<i32>} : memref<8x128xf32, #tpu.memory_space<vmem>>, vector<8x128xf32>,
    return
  }
}

</mosaic_0001>

<bundles_post_ra>
// kernel: tpu_custom_call.1
= control target key start
LH: loop header
LB: loop body
LE: loop exit
PB: predicated region body
PF: predicated region fallthrough
CT: control target
= control target key end

     0   :  { %18 = vsyncpa [#allocation3], 0  ;;  %s3378_s0 = inlined_call_operand.vmem [shape: f32[16,8], index: 0, kind: input, shape index: {}]   ;;  %s3379_s1 = inlined_call_operand.vmem [shape: bf16[16,16], index: 1, kind: input, shape index: {}]   ;;  %s3380_s2 = inlined_call_operand.vmem [shape: f32[8,16], index: 2, kind: input, shape index: {}]   ;;  %s3381_s3 = inlined_call_operand.vmem [shape: f32[1,256], index: 3, kind: input, shape index: {}]   ;;  %s3382_s4 = inlined_call_operand.vmem [shape: bf16[1,8,256], index: 4, kind: input, shape index: {}]   ;;  %s3383_s5 = inlined_call_operand.vmem [shape: bf16[256,4], index: 5, kind: input, shape index: {}]   ;;  %s3384_s6 = inlined_call_operand.vmem [shape: f32[2,1,128], index: 6, kind: input, shape index: {}]   ;;  %s3385_s7 = inlined_call_operand.vmem [shape: bf16[2,128,256], index: 7, kind: input, shape index: {}]   ;;  %s3386_s8 = inlined_call_operand.vmem [shape: bf16[256,4], index: 8, kind: input, shape index: {}]   ;;  %s3387_s9 = inlined_call_operand.vmem [shape: f32[2,1,128], index: 9, kind: input, shape index: {}]   ;;  %s3388_s10 = inlined_call_operand.hbm [shape: bf16[2,128,256], index: 10, kind: input, shape index: {}]   ;;  %s3389_s11 = inlined_call_operand.vmem [shape: bf16[256,4], index: 11, kind: input, shape index: {}]   ;;  %s3390_s12 = inlined_call_operand.vmem [shape: f32[2,1,128], index: 12, kind: input, shape index: {}]   ;;  %s3391_s13 = inlined_call_operand.hbm [shape: f32[8,128], index: 13, kind: output, shape index: {}]  }
   0x1   :  { %19 = vsyncpa [#allocation4], 0  ;;  %s2853_s25 = smov [#allocation2]   ;;  %s2805_s29 = scalar_lea.hbm %s3388_s10, 4096 }
   0x2   :  { %s45_s26 = sshll.u32 %s2853_s25, 4  ;;  %p2806_p0 = scmp.ne.s32.totalorder %s3388_s10, %s2805_s29  ;;  %s46_s26 = int_to_ptr.vmem [resolvable:$true] %s45_s26 }
   0x3   :  { %p2809_p1 = scmp.lt.u32.totalorder %s2805_s29, %s3388_s10 }
   0x5   :  { %p2811_p2 = pnand %p2809_p1, %p2806_p0 }
   0x7   :  { %2814 = shalt.err (!%p2811_p2)
}
   0x8   :  { %s2815_s17 = scalar_lea.vmem %s46_s26, 4096  ;;  %p2820_p4 = scmp.lt.s32.totalorder %s46_s26, %s46_s26 }
   0x9   :  { %p2816_p3 = scmp.ne.s32.totalorder %s46_s26, %s2815_s17  ;;  %p2821_p5 = scmp.lt.s32.totalorder %s2815_s17, %s2815_s17 }
   0xb   :  { %p2822_p6 = por %p2821_p5, %p2820_p4 }
   0xd   :  { %p2823_p7 = pnand %p2822_p6, %p2816_p3 }
   0xf   :  { %2826 = shalt.err (!%p2823_p7)
}
  0x10   :  { %s2854_s18 = smov 128   ;;  %s2855_s19 = smov 8  }
  0x11   :  { %51 = dma.hbm_to_vmem [thread:$0]  %s3388_s10, 4096, %s46_s26, [#allocation3], %s2854_s18, %s2854_s18, %s2855_s19  }
  0x12   :  { %2849 = dma.done.wait [#allocation3], 4096  }
  0x13   :  { %2850 = vsyncadd [#allocation3], 4294963200  ;;  %v2856_v0 = vmov 0   ;;  %v66_v1 = vld [vmem:[%s3382_s4] sm:$0xff]  ;;  %vm87_vm0 = vcmask 1043456   ;;  %v64_v3 = vld [vmem:[%s3378_s0 + $0x8] sm:$0xff]  ;;  %v68_v25 = vlaneseq }
  0x14   :  { %126 = vmatprep.mubr.bf16.mxu0 %v2856_v0  ;;  %v63_v2 = vld [vmem:[%s3378_s0] sm:$0xff]  ;;  %v2289_v4 = vcombine.high %v66_v1, %v66_v1  ;;  %v2288_v5 = vcombine.low %v66_v1, %v66_v1  ;;  %v2613_v10 = vld [vmem:[%s3383_s5 + $0x48] sm:$0xff]   ;;  %vm83_vm1 = vcmask 64512   ;;  %v2615_v12 = vld [vmem:[%s3383_s5 + $0x50] sm:$0xff]   ;;  %v2857_v24 = vmov 0.0  }
  0x15   :  { %v2611_v6 = vld [vmem:[%s3383_s5 + $0x40] sm:$0xff]   ;;  %v65_v9 = vpack.c.bf16 %v64_v3, %v63_v2  ;;  %v2614_v11 = vld [vmem:[%s3383_s5 + $0x8] sm:$0xff]   ;;  %v2616_v13 = vld [vmem:[%s3383_s5 + $0x10] sm:$0xff]   ;;  %v69_v26 = vshrl.u32 %v68_v25, 7  ;;  %v2858_v42 = vmov 2   ;;  %v2859_v43 = vmov 3  }
  0x16   :  { %v2612_v7 = vld [vmem:[%s3383_s5] sm:$0xff]   ;;  %2290 = vmatprep.subr.msk.bf16.mxu0 %vm87_vm0, %v2289_v4  ;;  %v89_v8 = vsel %vm87_vm0, %v2288_v5, 0  ;;  %2437 = vmatprep.subr.bf16.mxu1 %v2611_v6  ;;  %v2617_v14 = vld [vmem:[%s3383_s5 + $0x58] sm:$0xff]   ;;  %v2621_v18 = vld [vmem:[%s3383_s5 + $0x68] sm:$0xff]   ;;  %vm340_vm2 = vcmask 7168   ;;  %vm512_vm3 = vcmask 15368  }
  0x17   :  { %95 = vmatpush1.bf16.msra.mxu0 %v89_v8  ;;  %2438 = vmatpush3.bf16.msra.mxu1 %v2612_v7  ;;  %v2618_v15 = vld [vmem:[%s3383_s5 + $0x18] sm:$0xff]   ;;  %v2619_v16 = vld [vmem:[%s3383_s5 + $0x60] sm:$0xff]   ;;  %v2622_v19 = vld [vmem:[%s3383_s5 + $0x28] sm:$0xff]   ;;  %v3007_v27 = vsub.s32 0, %v69_v26  ;;  %v74_v29 = vsub.s32 1, %v69_v26  ;;  %vm2862_vm4 = vmmov 0  }
  0x18   :  { %2439 = vmatprep.subr.bf16.mxu1 %v2613_v10  ;;  %v2620_v17 = vld [vmem:[%s3383_s5 + $0x20] sm:$0xff]   ;;  %v2623_v20 = vld [vmem:[%s3383_s5 + $0x70] sm:$0xff]   ;;  %v2625_v22 = vld [vmem:[%s3383_s5 + $0x78] sm:$0xff]   ;;  %2518 = vmatprep.subr.bf16.mxu0 %v2857_v24  ;;  %vm404_vm5 = vcmask 130048  }
  0x19   :  { %v2624_v21 = vld [vmem:[%s3383_s5 + $0x30] sm:$0xff]   ;;  %v2626_v23 = vld [vmem:[%s3383_s5 + $0x38] sm:$0xff]   ;;  %v62_v28 = vld [vmem:[%s3381_s3] sm:$0x3]  ;;  %2585 = vset.pattern.permute.xlu1 %v2858_v42  ;;  %2587 = vset.pattern.permute.xlu0 %v2859_v43  ;;  %s2860_s3 = smov 127   ;;  %s2861_s5 = smov 2  }
  0x1a   :  { %2291 = vmatmul.mubr.msk.bf16.vlgmr.msra.gmra.mrb[0].mxu0 %vm83_vm1, %v65_v9  ;;  %v3013_v30 = vrot.slane %v62_v28, %v3007_v27  ;;  %v3015_v32 = vrot.slane %v62_v28, %v74_v29 }
  0x1b   :  { %2440 = vmatpush3.bf16.msra.mxu1 %v2614_v11  ;;  %2520 = vmatprep.mubr.msk.bf16.mxu0 %vm2862_vm4, %v2857_v24 }
  0x1c   :  { %2441 = vmatprep.subr.bf16.mxu1 %v2615_v12 }
  0x1f   :  { %2442 = vmatpush3.bf16.msra.mxu1 %v2616_v13 }
  0x20   :  { %2443 = vmatprep.subr.bf16.mxu1 %v2617_v14 }
  0x23   :  { %2444 = vmatpush3.bf16.msra.mxu1 %v2618_v15 }
  0x24   :  { %2445 = vmatprep.subr.bf16.mxu1 %v2619_v16 }
  0x27   :  { %2446 = vmatpush3.bf16.msra.mxu1 %v2620_v17 }
  0x28   :  { %2447 = vmatprep.subr.bf16.mxu1 %v2621_v18 }
  0x2b   :  { %2448 = vmatpush3.bf16.msra.mxu1 %v2622_v19 }
  0x2c   :  { %2449 = vmatprep.subr.bf16.mxu1 %v2623_v20 }
  0x2f   :  { %2450 = vmatpush3.bf16.msra.mxu1 %v2624_v21 }
  0x30   :  { %2451 = vmatprep.subr.bf16.mxu1 %v2625_v22 }
  0x33   :  { %2452 = vmatpush3.bf16.msra.mxu1 %v2626_v23 }
  0xed   :  { %v128_v31 = vpop.f32.mrb[0].mxu0 }
  0xee   :  { %v130_v33 = vpop.f32.mrb[1].mxu0  ;;  %v129_v35 = vadd.f32 %v128_v31, %v3013_v30 }
  0xef   :  { %v132_v34 = vpop.f32.mrb[2].mxu0  ;;  %v131_v38 = vadd.f32 %v130_v33, %v3015_v32 }
  0xf0   :  { %v133_v36 = vadd.f32 %v132_v34, %v3013_v30  ;;  %v134_v37 = vpop.f32.mrb[3].mxu0 }
  0xf1   :  { %v135_v39 = vadd.f32 %v134_v37, %v3015_v32 }
  0xf2   :  { %v137_v40 = vpack.c.bf16 %v133_v36, %v129_v35 }
  0xf3   :  { %v3021_v41 = vpack.c.bf16 %v135_v39, %v131_v38 }
  0xf4   :  { %2519 = vmatpush3.bf16.msra.mxu0 %v137_v40 }
  0xf5   :  { %299 = vmatprep.mubr.bf16.mxu1 %v3021_v41  ;;  %2524 = vmatprep.subr.bf16.mxu0 %v2857_v24 }
  0xf6   :  { %300 = vmatmul.mubr.bf16.vlgmr.msra.gmra.mrb[0].mxu1 %v137_v40 }
 0x1c9   :  { %v2453_v44 = vpop.f32.mrb[0].mxu1 }
 0x1ca   :  { %v2454_v45 = vpop.f32.mrb[1].mxu1 }
 0x1cb   :  { %v2455_v46 = vadd.f32 %v2454_v45, %v2453_v44  ;;  %v2456_v47 = vpop.f32.mrb[2].mxu1 }
 0x1cc   :  { %v2457_v48 = vpop.f32.mrb[3].mxu1 }
 0x1cd   :  { %v2458_v49 = vadd.f32 %v2457_v48, %v2456_v47  ;;  %474 = vrot.lane.b32.xlu1 %v2455_v46, %s2860_s3  ;;  %v341_v50 = vsel %vm340_vm2, %v2455_v46, -inf  ;;  %v513_v52 = vsel %vm512_vm3, %v2455_v46, -inf }
 0x1cf   :  { %v342_v51 = vsel %vm340_vm2, %v2458_v49, -inf  ;;  %v514_v53 = vsel %vm512_vm3, %v2458_v49, -inf }
 0x1d0   :  { %v343_v54 = vmax.f32 %v341_v50, %v342_v51  ;;  %v515_v55 = vmax.f32 %v513_v52, %v514_v53  ;;  %v3046_v53 = vld [vmem:[%s3379_s1] sm:$0xff]  }
 0x1d1   :  { %476 = vrot.lane.b32.xlu1 %v2458_v49, %s2860_s3 }
 0x1d2   :  { %v344_v56 = vrot.slane %v343_v54, 4  ;;  %v516_v57 = vrot.slane %v515_v55, 4 }
 0x1d4   :  { %v345_v58 = vmax.f32 %v343_v54, %v344_v56  ;;  %v517_v59 = vmax.f32 %v515_v55, %v516_v57 }
 0x1d5   :  { %367 = vperm.xlu1 %2585, %v2458_v49  }
 0x1d6   :  { %v346_v60 = vrot.slane %v345_v58, 2  ;;  %v518_v61 = vrot.slane %v517_v59, 2 }
 0x1d8   :  { %v347_v62 = vmax.f32 %v345_v58, %v346_v60  ;;  %v519_v63 = vmax.f32 %v517_v59, %v518_v61 }
 0x1d9   :  { %2586 = vset.pattern.permute.xlu1 %v2859_v43 }
 0x1da   :  { %533 = vperm.xlu1 %2586, %v2455_v46   ;;  %v348_v1 = vrot.slane %v347_v62, 1  ;;  %v520_v3 = vrot.slane %v519_v63, 1 }
 0x1dc   :  { %v349_v2 = vmax.f32 %v347_v62, %v348_v1  ;;  %v521_v4 = vmax.f32 %v519_v63, %v520_v3 }
 0x1de   :  { %351 = vrot.lane.b32.xlu0 %v349_v2, %s2861_s5  ;;  %2589 = vset.pattern.permute.xlu1 %v2858_v42 }
 0x1e2   :  { %523 = vrot.lane.b32.xlu0 %v521_v4, %s2861_s5 }
 0x1e6   :  { %537 = vperm.xlu0 %2587, %v2458_v49  }
 0x1ea   :  { %2588 = vset.pattern.permute.xlu0 %v2858_v42 }
 0x1eb   :  { %362 = vperm.xlu0 %2588, %v2455_v46  }
 0x23f   :  { %v475_v19 = vpop.permute.xlu1 %474 }
 0x243   :  { %v477_v20 = vpop.permute.xlu1 %476 }
 0x250   :  { %v352_v5 = vpop.permute.xlu0 %351 }
 0x251   :  { %v354_v6 = vadd.f32 %v2455_v46, %v352_v5  ;;  %v355_v7 = vadd.f32 %v2458_v49, %v352_v5 }
 0x253   :  { %v356_v8 = vmul.f32 0.2, %v354_v6  ;;  %v357_v9 = vmul.f32 0.2, %v355_v7 }
 0x254   :  { %v524_v10 = vpop.permute.xlu0 %523  ;;  %v368_v23 = vpop.permute.xlu1 %367 }
 0x255   :  { %v358_v11 = vmax.f32 %v354_v6, %v356_v8  ;;  %v359_v12 = vmax.f32 %v355_v7, %v357_v9  ;;  %v526_v13 = vadd.f32 %v2455_v46, %v524_v10  ;;  %v527_v14 = vadd.f32 %v2458_v49, %v524_v10  ;;  %v2630_v7 = vld [vmem:[%s3385_s7 + $0x84] ss:$8 sps:$4 sm:$0xff]   ;;  %v2633_v8 = vld [vmem:[%s3385_s7 + $0x94] ss:$8 sps:$4 sm:$0xff]   ;;  %v2631_v9 = vld [vmem:[%s3385_s7 + $0x90] ss:$8 sps:$4 sm:$0xff]  }
 0x256   :  { %v2863_v6 = vmov 8   ;;  %v2636_v10 = vld [vmem:[%s3385_s7 + $0xa4] ss:$8 sps:$4 sm:$0xff]  }
 0x257   :  { %v528_v15 = vmul.f32 0.2, %v526_v13  ;;  %387 = vperm.xlu0 %2588, %v359_v12   ;;  %382 = vperm.xlu1 %2589, %v358_v11   ;;  %v529_v17 = vmul.f32 0.2, %v527_v14  ;;  %v2634_v11 = vld [vmem:[%s3385_s7 + $0xa0] ss:$8 sps:$4 sm:$0xff]  }
 0x258   :  { %v2639_v12 = vld [vmem:[%s3385_s7 + $0xb4] ss:$8 sps:$4 sm:$0xff]  }
 0x259   :  { %v530_v16 = vmax.f32 %v526_v13, %v528_v15  ;;  %v531_v18 = vmax.f32 %v527_v14, %v529_v17  ;;  %v534_v26 = vpop.permute.xlu1 %533  ;;  %v2637_v13 = vld [vmem:[%s3385_s7 + $0xb0] ss:$8 sps:$4 sm:$0xff]   ;;  %v2642_v14 = vld [vmem:[%s3385_s7 + $0xc4] ss:$8 sps:$4 sm:$0xff]   ;;  %v2640_v15 = vld [vmem:[%s3385_s7 + $0xc0] ss:$8 sps:$4 sm:$0xff]  }
 0x25a   :  { %v2643_v17 = vld [vmem:[%s3385_s7 + $0xd0] ss:$8 sps:$4 sm:$0xff]  }
 0x25b   :  { %2590 = vset.pattern.permute.xlu1 %v2859_v43 }
 0x25c   :  { %552 = vperm.xlu1 %2590, %v530_v16   ;;  %v2645_v16 = vld [vmem:[%s3385_s7 + $0xd4] ss:$8 sps:$4 sm:$0xff]  }
 0x260   :  { %557 = vperm.xlu1 %2590, %v531_v18   ;;  %v2648_v18 = vld [vmem:[%s3385_s7 + $0xe4] ss:$8 sps:$4 sm:$0xff]  }
 0x265   :  { %v538_v21 = vpop.permute.xlu0 %537 }
 0x26a   :  { %v363_v22 = vpop.permute.xlu0 %362 }
 0x275   :  { %308 = vxpose.xlu0.b32.start [1/2] (short) (narrow) %v2455_v46, 8 }
 0x279   :  { %309 = vxpose.xlu0.b32.end [2/2] (short) (narrow) %v2458_v49, 8 }
 0x289   :  { %480 = vxpose.xlu1.b32.start [1/2] (short) (narrow) %v475_v19, 8  ;;  %v2646_v19 = vld [vmem:[%s3385_s7 + $0xe0] ss:$8 sps:$4 sm:$0xff]  }
 0x28d   :  { %481 = vxpose.xlu1.b32.end [2/2] (short) (narrow) %v477_v20, 8 }
 0x2a2   :  { %2591 = vset.pattern.permute.xlu0 %v2863_v6 }
 0x2ab   :  { %2592 = vset.pattern.permute.xlu1 %v2863_v6 }
 0x2d6   :  { %v388_v25 = vpop.permute.xlu0 %387  ;;  %v383_v34 = vpop.permute.xlu1 %382 }
 0x2db   :  { %v553_v44 = vpop.permute.xlu1 %552 }
 0x2df   :  { %v558_v47 = vpop.permute.xlu1 %557 }
 0x2f5   :  { %v324_v28 = vpop.trf.xlu0 }
 0x2f6   :  { %v373_v29 = vrot.slane %v324_v28, %v3007_v27 }
 0x2f8   :  { %v374_v31 = vadd.f32 %v373_v29, %v363_v22  ;;  %v375_v33 = vadd.f32 %v373_v29, %v368_v23 }
 0x2fa   :  { %v376_v35 = vmul.f32 0.2, %v374_v31  ;;  %v377_v36 = vmul.f32 0.2, %v375_v33 }
 0x2fc   :  { %v378_v37 = vmax.f32 %v374_v31, %v376_v35  ;;  %v379_v38 = vmax.f32 %v375_v33, %v377_v36 }
 0x2fe   :  { %v390_v39 = vsub.f32 %v378_v37, %v383_v34  ;;  %v391_v40 = vsub.f32 %v379_v38, %v388_v25  ;;  %v2651_v38 = vld [vmem:[%s3385_s7 + $0xf4] ss:$8 sps:$4 sm:$0xff]  }
 0x300   :  { %v392_v45 = vmul.f32 1.442695, %v390_v39  ;;  %v394_v46 = vmul.f32 1.442695, %v391_v40  ;;  %v2649_v40 = vld [vmem:[%s3385_s7 + $0xf0] ss:$8 sps:$4 sm:$0xff]  }
 0x302   :  { %2756 = vpow2.f32 %v392_v45  ;;  %v2654_v45 = vld [vmem:[%s3385_s7 + $0x4] ss:$8 sps:$4 sm:$0xff]  }
 0x303   :  { %2758 = vpow2.f32 %v394_v46  ;;  %v2676_v46 = vld [vmem:[%s3386_s8 + $0x40] sm:$0xff]  }
 0x304   :  { %2463 = vmatprep.subr.bf16.mxu1 %v2676_v46 }
 0x309   :  { %v496_v48 = vpop.trf.xlu1 }
 0x30a   :  { %v543_v49 = vrot.slane %v496_v48, %v3007_v27  ;;  %v2678_v48 = vld [vmem:[%s3386_s8 + $0x48] sm:$0xff]  }
 0x30c   :  { %v2757_v50 = vpop.eup %2756  ;;  %v544_v51 = vadd.f32 %v543_v49, %v534_v26  ;;  %v545_v52 = vadd.f32 %v543_v49, %v538_v21  ;;  %v2679_v49 = vld [vmem:[%s3386_s8 + $0x8] sm:$0xff]  }
 0x30d   :  { %v2759_v54 = vpop.eup %2758 }
 0x30e   :  { %v546_v55 = vmul.f32 0.2, %v544_v51  ;;  %v547_v56 = vmul.f32 0.2, %v545_v52  ;;  %v396_v57 = vpack.c.bf16 %v2759_v54, %v2757_v50  ;;  %v2680_v50 = vld [vmem:[%s3386_s8 + $0x50] sm:$0xff]   ;;  %v2683_v54 = vld [vmem:[%s3386_s8 + $0x18] sm:$0xff]  }
 0x310   :  { %v548_v58 = vmax.f32 %v544_v51, %v546_v55  ;;  %v549_v59 = vmax.f32 %v545_v52, %v547_v56  ;;  %v403_v60 = vmul.bf16 %v3046_v53, %v396_v57  ;;  %v2681_v51 = vld [vmem:[%s3386_s8 + $0x10] sm:$0xff]   ;;  %v2682_v52 = vld [vmem:[%s3386_s8 + $0x58] sm:$0xff]   ;;  %v2684_v55 = vld [vmem:[%s3386_s8 + $0x60] sm:$0xff]  }
 0x311   :  { %v2685_v56 = vld [vmem:[%s3386_s8 + $0x20] sm:$0xff]   ;;  %v2686_v57 = vld [vmem:[%s3386_s8 + $0x68] sm:$0xff]  }
 0x312   :  { %v560_v61 = vsub.f32 %v548_v58, %v553_v44  ;;  %v561_v62 = vsub.f32 %v549_v59, %v558_v47  ;;  %2521 = vmatmul.mubr.msk.bf16.vlgmr.msra.gmra.mrb[4].mxu0 %vm404_vm5, %v403_v60  ;;  %v2677_v47 = vld [vmem:[%s3386_s8] sm:$0xff]   ;;  %v2687_v58 = vld [vmem:[%s3386_s8 + $0x28] sm:$0xff]  }
 0x313   :  { %2525 = vmatpush3.bf16.msra.mxu0 %v3021_v41  ;;  %2526 = vmatprep.mubr.msk.bf16.mxu0 %vm2862_vm4, %v2857_v24  ;;  %v2628_v41 = vld [vmem:[%s3385_s7 + $0x80] ss:$8 sps:$4 sm:$0xff]  }
 0x314   :  { %v562_v63 = vmul.f32 1.442695, %v560_v61  ;;  %v564_v1 = vmul.f32 1.442695, %v561_v62  ;;  %753 = vmatprep.subr.bf16.mxu0 %v2630_v7  ;;  %2464 = vmatpush3.bf16.msra.mxu1 %v2677_v47  ;;  %v2313_v61 = vld [vmem:[%s3384_s6 + $0x1] ss:$0 sm:$0xff] }
 0x315   :  { %2465 = vmatprep.subr.bf16.mxu1 %v2678_v48  ;;  %v2652_v7 = vld [vmem:[%s3385_s7] ss:$8 sps:$4 sm:$0xff]  }
 0x316   :  { %2760 = vpow2.f32 %v562_v63 }
 0x317   :  { %2762 = vpow2.f32 %v564_v1 }
 0x318   :  { %2466 = vmatpush3.bf16.msra.mxu1 %v2679_v49 }
 0x319   :  { %2467 = vmatprep.subr.bf16.mxu1 %v2680_v50 }
 0x31c   :  { %2468 = vmatpush3.bf16.msra.mxu1 %v2681_v51 }
 0x31d   :  { %2469 = vmatprep.subr.bf16.mxu1 %v2682_v52 }
 0x320   :  { %v2761_v2 = vpop.eup %2760  ;;  %2470 = vmatpush3.bf16.msra.mxu1 %v2683_v54 }
 0x321   :  { %v2763_v3 = vpop.eup %2762  ;;  %2471 = vmatprep.subr.bf16.mxu1 %v2684_v55 }
 0x322   :  { %v566_v4 = vpack.c.bf16 %v2763_v3, %v2761_v2 }
 0x324   :  { %v567_v5 = vmul.bf16 %v3046_v53, %v566_v4  ;;  %2472 = vmatpush3.bf16.msra.mxu1 %v2685_v56 }
 0x325   :  { %2473 = vmatprep.subr.bf16.mxu1 %v2686_v57 }
 0x326   :  { %2527 = vmatmul.mubr.msk.bf16.vlgmr.msra.gmra.mrb[8].mxu0 %vm404_vm5, %v567_v5  ;;  %v2310_v5 = vld [vmem:[%s3384_s6] ss:$0 sm:$0xff] }
 0x327   :  { %785 = vmatprep.mubr.bf16.mxu0 %v2856_v0  ;;  %754 = vmatpush1.bf16.msra.mxu0 %v2628_v41 }
 0x328   :  { %755 = vmatprep.subr.bf16.mxu0 %v2633_v8  ;;  %2474 = vmatpush3.bf16.msra.mxu1 %v2687_v58 }
 0x32b   :  { %756 = vmatpush1.bf16.msra.mxu0 %v2631_v9 }
 0x32c   :  { %757 = vmatprep.subr.bf16.mxu0 %v2636_v10  ;;  %v2657_v10 = vld [vmem:[%s3385_s7 + $0x14] ss:$8 sps:$4 sm:$0xff]  }
 0x32f   :  { %758 = vmatpush1.bf16.msra.mxu0 %v2634_v11 }
 0x330   :  { %759 = vmatprep.subr.bf16.mxu0 %v2639_v12 }
 0x333   :  { %760 = vmatpush1.bf16.msra.mxu0 %v2637_v13  ;;  %v2655_v13 = vld [vmem:[%s3385_s7 + $0x10] ss:$8 sps:$4 sm:$0xff]  }
 0x334   :  { %761 = vmatprep.subr.bf16.mxu0 %v2642_v14 }
 0x337   :  { %762 = vmatpush1.bf16.msra.mxu0 %v2640_v15  ;;  %v2660_v15 = vld [vmem:[%s3385_s7 + $0x24] ss:$8 sps:$4 sm:$0xff]  }
 0x338   :  { %763 = vmatprep.subr.bf16.mxu0 %v2645_v16  ;;  %v2658_v16 = vld [vmem:[%s3385_s7 + $0x20] ss:$8 sps:$4 sm:$0xff]  }
 0x33b   :  { %764 = vmatpush1.bf16.msra.mxu0 %v2643_v17  ;;  %v2663_v17 = vld [vmem:[%s3385_s7 + $0x34] ss:$8 sps:$4 sm:$0xff]  }
 0x33c   :  { %765 = vmatprep.subr.bf16.mxu0 %v2648_v18  ;;  %v2661_v18 = vld [vmem:[%s3385_s7 + $0x30] ss:$8 sps:$4 sm:$0xff]  }
 0x33f   :  { %766 = vmatpush1.bf16.msra.mxu0 %v2646_v19  ;;  %v2666_v19 = vld [vmem:[%s3385_s7 + $0x44] ss:$8 sps:$4 sm:$0xff]  }
 0x340   :  { %767 = vmatprep.subr.bf16.mxu0 %v2651_v38 }
 0x343   :  { %768 = vmatpush1.bf16.msra.mxu0 %v2649_v40 }
 0x344   :  { %876 = vmatprep.subr.bf16.mxu0 %v2654_v45 }
 0x3e5   :  { %v3100_v20 = vpop.f32.mrb[4].mxu0 }
 0x3e6   :  { %v2522_v21 = vpop.f32.mrb[5].mxu0  ;;  %v449_v31 = vmax.f32 %v3100_v20, 1e-09 }
 0x3e7   :  { %v3102_v22 = vpop.f32.mrb[6].mxu0  ;;  %v2669_v21 = vld [vmem:[%s3385_s7 + $0x54] ss:$8 sps:$4 sm:$0xff]  }
 0x3e8   :  { %v2523_v23 = vpop.f32.mrb[7].mxu0  ;;  %v450_v35 = vmax.f32 %v3102_v22, 1e-09 }
 0x3e9   :  { %v2672_v23 = vld [vmem:[%s3385_s7 + $0x64] ss:$8 sps:$4 sm:$0xff]  }
 0x3f9   :  { %v605_v25 = vpop.f32.mrb[8].mxu0 }
 0x3fa   :  { %v612_v26 = vmax.f32 %v605_v25, 1e-09  ;;  %v2528_v28 = vpop.f32.mrb[9].mxu0 }
 0x3fb   :  { %v608_v29 = vpop.f32.mrb[10].mxu0  ;;  %v2673_v28 = vld [vmem:[%s3385_s7 + $0x70] ss:$8 sps:$4 sm:$0xff]  }
 0x3fc   :  { %2764 = vrcp.f32 %v612_v26  ;;  %v613_v33 = vmax.f32 %v608_v29, 1e-09  ;;  %v2529_v34 = vpop.f32.mrb[11].mxu0  ;;  %v2675_v26 = vld [vmem:[%s3385_s7 + $0x74] ss:$8 sps:$4 sm:$0xff]  }
 0x3fd   :  { %v2691_v34 = vld [vmem:[%s3386_s8 + $0x38] sm:$0xff]  }
 0x3fe   :  { %2766 = vrcp.f32 %v613_v33  ;;  %v2690_v33 = vld [vmem:[%s3386_s8 + $0x78] sm:$0xff]  }
 0x3ff   :  { %2768 = vrcp.f32 %v449_v31  ;;  %v2689_v31 = vld [vmem:[%s3386_s8 + $0x30] sm:$0xff]  }
 0x400   :  { %2770 = vrcp.f32 %v450_v35 }
 0x406   :  { %v2765_v36 = vpop.eup %2764 }
 0x407   :  { %618 = vperm.xlu0 %2591, %v2765_v36  }
 0x408   :  { %v2767_v37 = vpop.eup %2766 }
 0x409   :  { %623 = vperm.xlu1 %2592, %v2767_v37   ;;  %v2769_v39 = vpop.eup %2768 }
 0x40a   :  { %v2771_v44 = vpop.eup %2770 }
 0x40b   :  { %455 = vperm.xlu0 %2591, %v2769_v39  }
 0x40d   :  { %460 = vperm.xlu1 %2592, %v2771_v44  }
 0x40f   :  { %2595 = vset.pattern.permute.xlu0 %v2859_v43 }
 0x411   :  { %2593 = vset.pattern.permute.xlu1 %v2858_v42 }
 0x486   :  { %v619_v59 = vpop.permute.xlu0 %618 }
 0x487   :  { %v626_v60 = vmul.f32 %v619_v59, %v605_v25  ;;  %v2670_v25 = vld [vmem:[%s3385_s7 + $0x60] ss:$8 sps:$4 sm:$0xff]  }
 0x488   :  { %v624_v62 = vpop.permute.xlu1 %623 }
 0x489   :  { %v627_v63 = vmul.f32 %v624_v62, %v608_v29  ;;  %v636_v2 = vadd.f32 %v2313_v61, %v626_v60  ;;  %v2688_v29 = vld [vmem:[%s3386_s8 + $0x70] sm:$0xff]  }
 0x48a   :  { %v456_v1 = vpop.permute.xlu0 %455  ;;  %2475 = vmatprep.subr.bf16.mxu1 %v2688_v29 }
 0x48b   :  { %v637_v3 = vadd.f32 %v2313_v61, %v627_v63  ;;  %v463_v4 = vmul.f32 %v456_v1, %v3100_v20  ;;  %v2664_v20 = vld [vmem:[%s3385_s7 + $0x40] ss:$8 sps:$4 sm:$0xff]   ;;  %2476 = vmatpush3.bf16.msra.mxu1 %v2689_v31 }
 0x48c   :  { %v461_v41 = vpop.permute.xlu1 %460  ;;  %2477 = vmatprep.subr.bf16.mxu1 %v2690_v33 }
 0x48d   :  { %v655_v8 = vpack.c.bf16 %v637_v3, %v636_v2  ;;  %v464_v9 = vmul.f32 %v461_v41, %v3102_v22  ;;  %v472_v11 = vadd.f32 %v2310_v5, %v463_v4  ;;  %v2667_v22 = vld [vmem:[%s3385_s7 + $0x50] ss:$8 sps:$4 sm:$0xff]  }
 0x48f   :  { %v473_v12 = vadd.f32 %v2310_v5, %v464_v9  ;;  %786 = vmatmul.mubr.bf16.vlgmr.msra.gmra.mrb[12].mxu0 %v655_v8  ;;  %2478 = vmatpush3.bf16.msra.mxu1 %v2691_v34 }
 0x490   :  { %877 = vmatpush1.bf16.msra.mxu0 %v2652_v7  ;;  %908 = vmatprep.mubr.bf16.mxu0 %v2856_v0 }
 0x491   :  { %v638_v14 = vpack.c.bf16 %v473_v12, %v472_v11  ;;  %878 = vmatprep.subr.bf16.mxu0 %v2657_v10  ;;  %2530 = vmatprep.subr.bf16.mxu1 %v2857_v24 }
 0x494   :  { %879 = vmatpush1.bf16.msra.mxu0 %v2655_v13 }
 0x495   :  { %880 = vmatprep.subr.bf16.mxu0 %v2660_v15 }
 0x498   :  { %881 = vmatpush1.bf16.msra.mxu0 %v2658_v16 }
 0x499   :  { %882 = vmatprep.subr.bf16.mxu0 %v2663_v17 }
 0x49c   :  { %883 = vmatpush1.bf16.msra.mxu0 %v2661_v18 }
 0x49d   :  { %884 = vmatprep.subr.bf16.mxu0 %v2666_v19 }
 0x4a0   :  { %885 = vmatpush1.bf16.msra.mxu0 %v2664_v20 }
 0x4a1   :  { %886 = vmatprep.subr.bf16.mxu0 %v2669_v21 }
 0x4a4   :  { %887 = vmatpush1.bf16.msra.mxu0 %v2667_v22 }
 0x4a5   :  { %888 = vmatprep.subr.bf16.mxu0 %v2672_v23 }
 0x4a8   :  { %889 = vmatpush1.bf16.msra.mxu0 %v2670_v25 }
 0x4a9   :  { %890 = vmatprep.subr.bf16.mxu0 %v2675_v26 }
 0x4ac   :  { %891 = vmatpush1.bf16.msra.mxu0 %v2673_v28 }
 0x4af   :  { %909 = vmatmul.mubr.bf16.vlgmr.msra.gmra.mrb[12].mxu0 %v638_v14 }
 0x582   :  { %v910_v35 = vpop.f32.mrb[12].mxu0 }
 0x583   :  { %v912_v36 = vpop.f32.mrb[13].mxu0  ;;  %v919_v38 = vadd.f32 %v910_v35, %v3013_v30 }
 0x584   :  { %v914_v37 = vpop.f32.mrb[14].mxu0  ;;  %v920_v44 = vadd.f32 %v912_v36, %v3015_v32 }
 0x585   :  { %v921_v39 = vadd.f32 %v914_v37, %v3013_v30  ;;  %v916_v40 = vpop.f32.mrb[15].mxu0 }
 0x586   :  { %v922_v45 = vadd.f32 %v916_v40, %v3015_v32 }
 0x587   :  { %v923_v46 = vpack.c.bf16 %v921_v39, %v919_v38 }
 0x588   :  { %v3224_v47 = vpack.c.bf16 %v922_v45, %v920_v44 }
 0x58a   :  { %1085 = vmatprep.mubr.bf16.mxu1 %v3224_v47 }
 0x58b   :  { %1086 = vmatmul.mubr.bf16.vlgmr.msra.gmra.mrb[4].mxu1 %v923_v46 }
 0x58c   :  { %2531 = vmatpush3.bf16.msra.mxu1 %v923_v46  ;;  %2532 = vmatprep.mubr.msk.bf16.mxu1 %vm2862_vm4, %v2857_v24 }
 0x58d   :  { %2536 = vmatprep.subr.bf16.mxu1 %v2857_v24 }
 0x65e   :  { %v2479_v48 = vpop.f32.mrb[4].mxu1 }
 0x65f   :  { %v2480_v49 = vpop.f32.mrb[5].mxu1 }
 0x660   :  { %v2481_v50 = vadd.f32 %v2480_v49, %v2479_v48  ;;  %v2482_v51 = vpop.f32.mrb[6].mxu1 }
 0x661   :  { %v2483_v52 = vpop.f32.mrb[7].mxu1 }
 0x662   :  { %v2484_v54 = vadd.f32 %v2483_v52, %v2482_v51  ;;  %v1290_v55 = vsel %vm512_vm3, %v2481_v50, -inf  ;;  %v1126_v57 = vsel %vm340_vm2, %v2481_v50, -inf }
 0x664   :  { %v1291_v56 = vsel %vm512_vm3, %v2484_v54, -inf  ;;  %v1127_v58 = vsel %vm340_vm2, %v2484_v54, -inf }
 0x665   :  { %v1292_v59 = vmax.f32 %v1290_v55, %v1291_v56  ;;  %v1128_v60 = vmax.f32 %v1126_v57, %v1127_v58 }
 0x667   :  { %v1293_v61 = vrot.slane %v1292_v59, 4  ;;  %v1129_v62 = vrot.slane %v1128_v60, 4 }
 0x669   :  { %v1294_v63 = vmax.f32 %v1292_v59, %v1293_v61  ;;  %v1130_v1 = vmax.f32 %v1128_v60, %v1129_v62 }
 0x66b   :  { %v1295_v2 = vrot.slane %v1294_v63, 2  ;;  %v1131_v3 = vrot.slane %v1130_v1, 2 }
 0x66d   :  { %v1296_v4 = vmax.f32 %v1294_v63, %v1295_v2  ;;  %v1132_v5 = vmax.f32 %v1130_v1, %v1131_v3 }
 0x66f   :  { %v1297_v41 = vrot.slane %v1296_v4, 1  ;;  %v1133_v7 = vrot.slane %v1132_v5, 1 }
 0x671   :  { %v1298_v8 = vmax.f32 %v1296_v4, %v1297_v41  ;;  %v1134_v9 = vmax.f32 %v1132_v5, %v1133_v7 }
 0x673   :  { %1300 = vrot.lane.b32.xlu1 %v1298_v8, %s2861_s5  ;;  %1136 = vrot.lane.b32.xlu0 %v1134_v9, %s2861_s5 }
 0x677   :  { %1254 = vrot.lane.b32.xlu1 %v2484_v54, %s2860_s3  ;;  %1252 = vrot.lane.b32.xlu0 %v2481_v50, %s2860_s3 }
 0x67b   :  { %1152 = vperm.xlu1 %2593, %v2484_v54   ;;  %1314 = vperm.xlu0 %2595, %v2484_v54  }
 0x67f   :  { %2594 = vset.pattern.permute.xlu1 %v2859_v43  ;;  %2596 = vset.pattern.permute.xlu0 %v2858_v42 }
 0x680   :  { %1310 = vperm.xlu1 %2594, %v2481_v50   ;;  %1147 = vperm.xlu0 %2596, %v2481_v50  }
 0x684   :  { %2597 = vset.pattern.permute.xlu1 %v2858_v42 }
 0x6e5   :  { %v1301_v10 = vpop.permute.xlu1 %1300  ;;  %v1137_v11 = vpop.permute.xlu0 %1136 }
 0x6e6   :  { %v1139_v12 = vadd.f32 %v2481_v50, %v1137_v11  ;;  %v1140_v13 = vadd.f32 %v2484_v54, %v1137_v11  ;;  %v1303_v14 = vadd.f32 %v2481_v50, %v1301_v10  ;;  %v1304_v18 = vadd.f32 %v2484_v54, %v1301_v10 }
 0x6e8   :  { %v1141_v15 = vmul.f32 0.2, %v1139_v12  ;;  %v1142_v16 = vmul.f32 0.2, %v1140_v13  ;;  %v1305_v19 = vmul.f32 0.2, %v1303_v14 }
 0x6e9   :  { %v1306_v21 = vmul.f32 0.2, %v1304_v18  ;;  %v1253_v25 = vpop.permute.xlu0 %1252  ;;  %v1255_v26 = vpop.permute.xlu1 %1254 }
 0x6ea   :  { %v1143_v17 = vmax.f32 %v1139_v12, %v1141_v15  ;;  %v1144_v20 = vmax.f32 %v1140_v13, %v1142_v16  ;;  %v1307_v22 = vmax.f32 %v1303_v14, %v1305_v19  ;;  %v2692_v12 = vld [vmem:[#allocation2 + $0x80] ss:$8 sps:$4 sm:$0xff]   ;;  %v2694_v13 = vld [vmem:[#allocation2 + $0x84] ss:$8 sps:$4 sm:$0xff]   ;;  %v2697_v14 = vld [vmem:[#allocation2 + $0x94] ss:$8 sps:$4 sm:$0xff]  }
 0x6eb   :  { %v1308_v23 = vmax.f32 %v1304_v18, %v1306_v21  ;;  %v2700_v15 = vld [vmem:[#allocation2 + $0xa4] ss:$8 sps:$4 sm:$0xff]   ;;  %v2698_v16 = vld [vmem:[#allocation2 + $0xa0] ss:$8 sps:$4 sm:$0xff]   ;;  %v2701_v18 = vld [vmem:[#allocation2 + $0xb0] ss:$8 sps:$4 sm:$0xff]  }
 0x6ec   :  { %1167 = vperm.xlu1 %2597, %v1143_v17   ;;  %1172 = vperm.xlu0 %2596, %v1144_v20   ;;  %v2703_v17 = vld [vmem:[#allocation2 + $0xb4] ss:$8 sps:$4 sm:$0xff]   ;;  %v2704_v19 = vld [vmem:[#allocation2 + $0xc0] ss:$8 sps:$4 sm:$0xff]   ;;  %v2707_v21 = vld [vmem:[#allocation2 + $0xd0] ss:$8 sps:$4 sm:$0xff]  }
 0x6ed   :  { %v2709_v20 = vld [vmem:[#allocation2 + $0xd4] ss:$8 sps:$4 sm:$0xff]  }
 0x6f0   :  { %2598 = vset.pattern.permute.xlu1 %v2859_v43 }
 0x6f1   :  { %1329 = vperm.xlu1 %2598, %v1307_v22   ;;  %v2712_v22 = vld [vmem:[#allocation2 + $0xe4] ss:$8 sps:$4 sm:$0xff]  }
 0x6f5   :  { %1334 = vperm.xlu1 %2598, %v1308_v23   ;;  %v2710_v23 = vld [vmem:[#allocation2 + $0xe0] ss:$8 sps:$4 sm:$0xff]  }
 0x6fa   :  { %v1315_v28 = vpop.permute.xlu0 %1314  ;;  %v1153_v31 = vpop.permute.xlu1 %1152 }
 0x6ff   :  { %v1148_v29 = vpop.permute.xlu0 %1147  ;;  %v1311_v34 = vpop.permute.xlu1 %1310 }
 0x70a   :  { %1094 = vxpose.xlu0.b32.start [1/2] (short) (narrow) %v2481_v50, 8 }
 0x70e   :  { %1095 = vxpose.xlu0.b32.end [2/2] (short) (narrow) %v2484_v54, 8 }
 0x71e   :  { %1258 = vxpose.xlu1.b32.start [1/2] (short) (narrow) %v1253_v25, 8 }
 0x722   :  { %1259 = vxpose.xlu1.b32.end [2/2] (short) (narrow) %v1255_v26, 8 }
 0x737   :  { %2599 = vset.pattern.permute.xlu0 %v2863_v6 }
 0x740   :  { %2600 = vset.pattern.permute.xlu1 %v2863_v6 }
 0x76b   :  { %v1173_v33 = vpop.permute.xlu0 %1172  ;;  %v1168_v37 = vpop.permute.xlu1 %1167 }
 0x770   :  { %v1330_v48 = vpop.permute.xlu1 %1329 }
 0x774   :  { %v1335_v54 = vpop.permute.xlu1 %1334 }
 0x78a   :  { %v1110_v35 = vpop.trf.xlu0 }
 0x78b   :  { %v1158_v36 = vrot.slane %v1110_v35, %v3007_v27 }
 0x78d   :  { %v1159_v38 = vadd.f32 %v1158_v36, %v1148_v29  ;;  %v1160_v39 = vadd.f32 %v1158_v36, %v1153_v31 }
 0x78f   :  { %v1161_v40 = vmul.f32 0.2, %v1159_v38  ;;  %v1162_v44 = vmul.f32 0.2, %v1160_v39 }
 0x791   :  { %v1163_v45 = vmax.f32 %v1159_v38, %v1161_v40  ;;  %v1164_v46 = vmax.f32 %v1160_v39, %v1162_v44 }
 0x793   :  { %v1175_v49 = vsub.f32 %v1163_v45, %v1168_v37  ;;  %v1176_v50 = vsub.f32 %v1164_v46, %v1173_v33  ;;  %v2715_v46 = vld [vmem:[#allocation2 + $0xf4] ss:$8 sps:$4 sm:$0xff]  }
 0x795   :  { %v1177_v51 = vmul.f32 1.442695, %v1175_v49  ;;  %v1179_v52 = vmul.f32 1.442695, %v1176_v50  ;;  %v2718_v50 = vld [vmem:[#allocation2 + $0x4] ss:$8 sps:$4 sm:$0xff]  }
 0x797   :  { %2772 = vpow2.f32 %v1177_v51  ;;  %v2740_v51 = vld [vmem:[%s3389_s11 + $0x40] sm:$0xff]  }
 0x798   :  { %2774 = vpow2.f32 %v1179_v52  ;;  %v2741_v52 = vld [vmem:[%s3389_s11] sm:$0xff]   ;;  %2489 = vmatprep.subr.bf16.mxu0 %v2740_v51 }
 0x799   :  { %2490 = vmatpush3.bf16.msra.mxu0 %v2741_v52 }
 0x79e   :  { %v1274_v55 = vpop.trf.xlu1 }
 0x79f   :  { %v1320_v56 = vrot.slane %v1274_v55, %v3007_v27  ;;  %v2743_v55 = vld [vmem:[%s3389_s11 + $0x8] sm:$0xff]  }
 0x7a1   :  { %v1321_v57 = vadd.f32 %v1320_v56, %v1311_v34  ;;  %v1322_v58 = vadd.f32 %v1320_v56, %v1315_v28  ;;  %v2773_v59 = vpop.eup %2772  ;;  %v2744_v56 = vld [vmem:[%s3389_s11 + $0x50] sm:$0xff]  }
 0x7a2   :  { %v2775_v60 = vpop.eup %2774 }
 0x7a3   :  { %v1323_v61 = vmul.f32 0.2, %v1321_v57  ;;  %v1324_v62 = vmul.f32 0.2, %v1322_v58  ;;  %v1181_v63 = vpack.c.bf16 %v2775_v60, %v2773_v59  ;;  %v2747_v59 = vld [vmem:[%s3389_s11 + $0x18] sm:$0xff]   ;;  %v2748_v60 = vld [vmem:[%s3389_s11 + $0x60] sm:$0xff]  }
 0x7a5   :  { %v1325_v1 = vmax.f32 %v1321_v57, %v1323_v61  ;;  %v1326_v2 = vmax.f32 %v1322_v58, %v1324_v62  ;;  %v1182_v3 = vmul.bf16 %v3046_v53, %v1181_v63  ;;  %v2745_v57 = vld [vmem:[%s3389_s11 + $0x10] sm:$0xff]   ;;  %v2746_v58 = vld [vmem:[%s3389_s11 + $0x58] sm:$0xff]   ;;  %v2749_v61 = vld [vmem:[%s3389_s11 + $0x20] sm:$0xff]  }
 0x7a6   :  { %v2750_v62 = vld [vmem:[%s3389_s11 + $0x68] sm:$0xff]  }
 0x7a7   :  { %v1337_v4 = vsub.f32 %v1325_v1, %v1330_v48  ;;  %v1338_v5 = vsub.f32 %v1326_v2, %v1335_v54  ;;  %2533 = vmatmul.mubr.msk.bf16.vlgmr.msra.gmra.mrb[8].mxu1 %vm404_vm5, %v1182_v3  ;;  %v2713_v48 = vld [vmem:[#allocation2 + $0xf0] ss:$8 sps:$4 sm:$0xff]  }
 0x7a8   :  { %2537 = vmatpush3.bf16.msra.mxu1 %v3224_v47  ;;  %2538 = vmatprep.mubr.msk.bf16.mxu1 %vm2862_vm4, %v2857_v24  ;;  %v2695_v47 = vld [vmem:[#allocation2 + $0x90] ss:$8 sps:$4 sm:$0xff]  }
 0x7a9   :  { %v1339_v41 = vmul.f32 1.442695, %v1337_v4  ;;  %v1341_v7 = vmul.f32 1.442695, %v1338_v5  ;;  %1530 = vmatprep.subr.bf16.mxu1 %v2694_v13  ;;  %v2742_v54 = vld [vmem:[%s3389_s11 + $0x48] sm:$0xff]  }
 0x7aa   :  { %2491 = vmatprep.subr.bf16.mxu0 %v2742_v54  ;;  %v2751_v63 = vld [vmem:[%s3389_s11 + $0x28] sm:$0xff]   ;;  %v2382_v3 = vld [vmem:[%s3387_s9 + $0x1] ss:$0 sm:$0xff] }
 0x7ab   :  { %2776 = vpow2.f32 %v1339_v41  ;;  %2492 = vmatpush3.bf16.msra.mxu0 %v2743_v55 }
 0x7ac   :  { %2778 = vpow2.f32 %v1341_v7  ;;  %2493 = vmatprep.subr.bf16.mxu0 %v2744_v56 }
 0x7af   :  { %2494 = vmatpush3.bf16.msra.mxu0 %v2745_v57 }
 0x7b0   :  { %2495 = vmatprep.subr.bf16.mxu0 %v2746_v58 }
 0x7b3   :  { %2496 = vmatpush3.bf16.msra.mxu0 %v2747_v59 }
 0x7b4   :  { %2497 = vmatprep.subr.bf16.mxu0 %v2748_v60 }
 0x7b5   :  { %v2777_v8 = vpop.eup %2776 }
 0x7b6   :  { %v2779_v9 = vpop.eup %2778 }
 0x7b7   :  { %v1343_v10 = vpack.c.bf16 %v2779_v9, %v2777_v8  ;;  %2498 = vmatpush3.bf16.msra.mxu0 %v2749_v61 }
 0x7b8   :  { %2499 = vmatprep.subr.bf16.mxu0 %v2750_v62 }
 0x7b9   :  { %v1344_v11 = vmul.bf16 %v3046_v53, %v1343_v10  ;;  %v2706_v53 = vld [vmem:[#allocation2 + $0xc4] ss:$8 sps:$4 sm:$0xff]   ;;  %v2379_v10 = vld [vmem:[%s3387_s9] ss:$0 sm:$0xff] }
 0x7bb   :  { %2539 = vmatmul.mubr.msk.bf16.vlgmr.msra.gmra.mrb[12].mxu1 %vm404_vm5, %v1344_v11  ;;  %2500 = vmatpush3.bf16.msra.mxu0 %v2751_v63 }
 0x7bc   :  { %1562 = vmatprep.mubr.bf16.mxu1 %v2856_v0  ;;  %1531 = vmatpush1.bf16.msra.mxu1 %v2692_v12  ;;  %v2716_v12 = vld [vmem:[#allocation2] ss:$8 sps:$4 sm:$0xff]  }
 0x7bd   :  { %1532 = vmatprep.subr.bf16.mxu1 %v2697_v14 }
 0x7c0   :  { %1533 = vmatpush1.bf16.msra.mxu1 %v2695_v47  ;;  %v2721_v47 = vld [vmem:[#allocation2 + $0x14] ss:$8 sps:$4 sm:$0xff]  }
 0x7c1   :  { %1534 = vmatprep.subr.bf16.mxu1 %v2700_v15 }
 0x7c4   :  { %1535 = vmatpush1.bf16.msra.mxu1 %v2698_v16 }
 0x7c5   :  { %1536 = vmatprep.subr.bf16.mxu1 %v2703_v17  ;;  %v2719_v17 = vld [vmem:[#allocation2 + $0x10] ss:$8 sps:$4 sm:$0xff]  }
 0x7c8   :  { %1537 = vmatpush1.bf16.msra.mxu1 %v2701_v18 }
 0x7c9   :  { %1538 = vmatprep.subr.bf16.mxu1 %v2706_v53  ;;  %v2724_v53 = vld [vmem:[#allocation2 + $0x24] ss:$8 sps:$4 sm:$0xff]  }
 0x7cc   :  { %1539 = vmatpush1.bf16.msra.mxu1 %v2704_v19  ;;  %v2722_v19 = vld [vmem:[#allocation2 + $0x20] ss:$8 sps:$4 sm:$0xff]  }
 0x7cd   :  { %1540 = vmatprep.subr.bf16.mxu1 %v2709_v20  ;;  %v2727_v20 = vld [vmem:[#allocation2 + $0x34] ss:$8 sps:$4 sm:$0xff]  }
 0x7d0   :  { %1541 = vmatpush1.bf16.msra.mxu1 %v2707_v21  ;;  %v2725_v21 = vld [vmem:[#allocation2 + $0x30] ss:$8 sps:$4 sm:$0xff]  }
 0x7d1   :  { %1542 = vmatprep.subr.bf16.mxu1 %v2712_v22  ;;  %v2730_v22 = vld [vmem:[#allocation2 + $0x44] ss:$8 sps:$4 sm:$0xff]  }
 0x7d4   :  { %1543 = vmatpush1.bf16.msra.mxu1 %v2710_v23  ;;  %v2728_v23 = vld [vmem:[#allocation2 + $0x40] ss:$8 sps:$4 sm:$0xff]  }
 0x7d5   :  { %1544 = vmatprep.subr.bf16.mxu1 %v2715_v46 }
 0x7d8   :  { %1545 = vmatpush1.bf16.msra.mxu1 %v2713_v48 }
 0x7d9   :  { %1653 = vmatprep.subr.bf16.mxu1 %v2718_v50 }
 0x87a   :  { %v3254_v25 = vpop.f32.mrb[8].mxu1 }
 0x87b   :  { %v2534_v26 = vpop.f32.mrb[9].mxu1  ;;  %v1227_v36 = vmax.f32 %v3254_v25, 1e-09 }
 0x87c   :  { %v3256_v28 = vpop.f32.mrb[10].mxu1  ;;  %v2731_v26 = vld [vmem:[#allocation2 + $0x50] ss:$8 sps:$4 sm:$0xff]  }
 0x87d   :  { %v2535_v29 = vpop.f32.mrb[11].mxu1  ;;  %v1228_v39 = vmax.f32 %v3256_v28, 1e-09 }
 0x87e   :  { %v2739_v29 = vld [vmem:[#allocation2 + $0x74] ss:$8 sps:$4 sm:$0xff]  }
 0x88e   :  { %v1382_v31 = vpop.f32.mrb[12].mxu1 }
 0x88f   :  { %v1389_v33 = vmax.f32 %v1382_v31, 1e-09  ;;  %v2540_v34 = vpop.f32.mrb[13].mxu1 }
 0x890   :  { %v1385_v35 = vpop.f32.mrb[14].mxu1  ;;  %v2753_v34 = vld [vmem:[%s3389_s11 + $0x30] sm:$0xff]  }
 0x891   :  { %2780 = vrcp.f32 %v1389_v33  ;;  %v1390_v37 = vmax.f32 %v1385_v35, 1e-09  ;;  %v2541_v38 = vpop.f32.mrb[15].mxu1  ;;  %v2752_v33 = vld [vmem:[%s3389_s11 + $0x70] sm:$0xff]  }
 0x892   :  { %2501 = vmatprep.subr.bf16.mxu0 %v2752_v33 }
 0x893   :  { %2782 = vrcp.f32 %v1390_v37  ;;  %2502 = vmatpush3.bf16.msra.mxu0 %v2753_v34 }
 0x894   :  { %2784 = vrcp.f32 %v1227_v36  ;;  %v2755_v36 = vld [vmem:[%s3389_s11 + $0x38] sm:$0xff]  }
 0x895   :  { %2786 = vrcp.f32 %v1228_v39 }
 0x89b   :  { %v2781_v40 = vpop.eup %2780 }
 0x89c   :  { %1395 = vperm.xlu0 %2599, %v2781_v40  }
 0x89d   :  { %v2783_v44 = vpop.eup %2782 }
 0x89e   :  { %1400 = vperm.xlu1 %2600, %v2783_v44   ;;  %v2785_v45 = vpop.eup %2784 }
 0x89f   :  { %v2787_v49 = vpop.eup %2786 }
 0x8a0   :  { %1233 = vperm.xlu0 %2599, %v2785_v45  }
 0x8a2   :  { %1238 = vperm.xlu1 %2600, %v2787_v49  }
 0x8a4   :  { %2603 = vset.pattern.permute.xlu0 %v2859_v43 }
 0x8a6   :  { %2601 = vset.pattern.permute.xlu1 %v2858_v42 }
 0x91b   :  { %v1396_v1 = vpop.permute.xlu0 %1395 }
 0x91c   :  { %v1403_v2 = vmul.f32 %v1396_v1, %v1382_v31  ;;  %v2737_v31 = vld [vmem:[#allocation2 + $0x70] ss:$8 sps:$4 sm:$0xff]  }
 0x91d   :  { %v1401_v4 = vpop.permute.xlu1 %1400 }
 0x91e   :  { %v1404_v5 = vmul.f32 %v1401_v4, %v1385_v35  ;;  %v1413_v7 = vadd.f32 %v2382_v3, %v1403_v2  ;;  %v2754_v35 = vld [vmem:[%s3389_s11 + $0x78] sm:$0xff]  }
 0x91f   :  { %v1234_v41 = vpop.permute.xlu0 %1233  ;;  %2503 = vmatprep.subr.bf16.mxu0 %v2754_v35 }
 0x920   :  { %v1414_v8 = vadd.f32 %v2382_v3, %v1404_v5  ;;  %v1241_v9 = vmul.f32 %v1234_v41, %v3254_v25  ;;  %v2733_v25 = vld [vmem:[#allocation2 + $0x54] ss:$8 sps:$4 sm:$0xff]   ;;  %2504 = vmatpush3.bf16.msra.mxu0 %v2755_v36 }
 0x921   :  { %v1239_v11 = vpop.permute.xlu1 %1238  ;;  %2542 = vmatprep.subr.bf16.mxu0 %v2857_v24 }
 0x922   :  { %v1432_v13 = vpack.c.bf16 %v1414_v8, %v1413_v7  ;;  %v1242_v14 = vmul.f32 %v1239_v11, %v3256_v28  ;;  %v1250_v15 = vadd.f32 %v2379_v10, %v1241_v9  ;;  %v2736_v28 = vld [vmem:[#allocation2 + $0x64] ss:$8 sps:$4 sm:$0xff]  }
 0x924   :  { %v1251_v16 = vadd.f32 %v2379_v10, %v1242_v14  ;;  %1563 = vmatmul.mubr.bf16.vlgmr.msra.gmra.mrb[16].mxu1 %v1432_v13 }
 0x925   :  { %1654 = vmatpush1.bf16.msra.mxu1 %v2716_v12  ;;  %1685 = vmatprep.mubr.bf16.mxu1 %v2856_v0  ;;  %v2734_v0 = vld [vmem:[#allocation2 + $0x60] ss:$8 sps:$4 sm:$0xff]  }
 0x926   :  { %v1415_v18 = vpack.c.bf16 %v1251_v16, %v1250_v15  ;;  %1655 = vmatprep.subr.bf16.mxu1 %v2721_v47 }
 0x929   :  { %1656 = vmatpush1.bf16.msra.mxu1 %v2719_v17 }
 0x92a   :  { %1657 = vmatprep.subr.bf16.mxu1 %v2724_v53 }
 0x92d   :  { %1658 = vmatpush1.bf16.msra.mxu1 %v2722_v19 }
 0x92e   :  { %1659 = vmatprep.subr.bf16.mxu1 %v2727_v20 }
 0x931   :  { %1660 = vmatpush1.bf16.msra.mxu1 %v2725_v21 }
 0x932   :  { %1661 = vmatprep.subr.bf16.mxu1 %v2730_v22 }
 0x935   :  { %1662 = vmatpush1.bf16.msra.mxu1 %v2728_v23 }
 0x936   :  { %1663 = vmatprep.subr.bf16.mxu1 %v2733_v25 }
 0x939   :  { %1664 = vmatpush1.bf16.msra.mxu1 %v2731_v26 }
 0x93a   :  { %1665 = vmatprep.subr.bf16.mxu1 %v2736_v28 }
 0x93d   :  { %1666 = vmatpush1.bf16.msra.mxu1 %v2734_v0 }
 0x93e   :  { %1667 = vmatprep.subr.bf16.mxu1 %v2739_v29 }
 0x941   :  { %1668 = vmatpush1.bf16.msra.mxu1 %v2737_v31 }
 0x944   :  { %1686 = vmatmul.mubr.bf16.vlgmr.msra.gmra.mrb[16].mxu1 %v1415_v18 }
 0xa17   :  { %v1687_v37 = vpop.f32.mrb[16].mxu1 }
 0xa18   :  { %v1689_v38 = vpop.f32.mrb[17].mxu1  ;;  %v1696_v40 = vadd.f32 %v1687_v37, %v3013_v30 }
 0xa19   :  { %v1691_v39 = vpop.f32.mrb[18].mxu1  ;;  %v1697_v46 = vadd.f32 %v1689_v38, %v3015_v32 }
 0xa1a   :  { %v1698_v44 = vadd.f32 %v1691_v39, %v3013_v30  ;;  %v1693_v45 = vpop.f32.mrb[19].mxu1 }
 0xa1b   :  { %v1699_v48 = vadd.f32 %v1693_v45, %v3015_v32 }
 0xa1c   :  { %v1700_v49 = vpack.c.bf16 %v1698_v44, %v1696_v40 }
 0xa1d   :  { %v3324_v50 = vpack.c.bf16 %v1699_v48, %v1697_v46 }
 0xa1f   :  { %1862 = vmatprep.mubr.bf16.mxu0 %v3324_v50 }
 0xa20   :  { %1863 = vmatmul.mubr.bf16.vlgmr.msra.gmra.mrb[16].mxu0 %v1700_v49 }
 0xa21   :  { %2543 = vmatpush3.bf16.msra.mxu0 %v1700_v49  ;;  %2544 = vmatprep.mubr.msk.bf16.mxu0 %vm2862_vm4, %v2857_v24 }
 0xa22   :  { %2548 = vmatprep.subr.bf16.mxu0 %v2857_v24 }
 0xaf3   :  { %v2505_v51 = vpop.f32.mrb[16].mxu0 }
 0xaf4   :  { %v2506_v52 = vpop.f32.mrb[17].mxu0 }
 0xaf5   :  { %v2507_v30 = vadd.f32 %v2506_v52, %v2505_v51  ;;  %v2508_v54 = vpop.f32.mrb[18].mxu0 }
 0xaf6   :  { %v2509_v55 = vpop.f32.mrb[19].mxu0 }
 0xaf7   :  { %v2510_v56 = vadd.f32 %v2509_v55, %v2508_v54  ;;  %v2067_v32 = vsel %vm512_vm3, %v2507_v30, -inf  ;;  %v1903_v58 = vsel %vm340_vm2, %v2507_v30, -inf }
 0xaf9   :  { %v2068_v57 = vsel %vm512_vm3, %v2510_v56, -inf  ;;  %v1904_v59 = vsel %vm340_vm2, %v2510_v56, -inf }
 0xafa   :  { %v2069_v60 = vmax.f32 %v2067_v32, %v2068_v57  ;;  %v1905_v61 = vmax.f32 %v1903_v58, %v1904_v59 }
 0xafc   :  { %v2070_v62 = vrot.slane %v2069_v60, 4  ;;  %v1906_v63 = vrot.slane %v1905_v61, 4 }
 0xafe   :  { %v2071_v1 = vmax.f32 %v2069_v60, %v2070_v62  ;;  %v1907_v2 = vmax.f32 %v1905_v61, %v1906_v63  ;;  %v2804_v60 = vld [vmem:[%s3379_s1] sm:$0xff]  }
 0xb00   :  { %v2072_v3 = vrot.slane %v2071_v1, 2  ;;  %v1908_v4 = vrot.slane %v1907_v2, 2 }
 0xb02   :  { %v2073_v5 = vmax.f32 %v2071_v1, %v2072_v3  ;;  %v1909_v41 = vmax.f32 %v1907_v2, %v1908_v4 }
 0xb04   :  { %v2074_v7 = vrot.slane %v2073_v5, 1  ;;  %v1910_v8 = vrot.slane %v1909_v41, 1 }
 0xb06   :  { %v2075_v9 = vmax.f32 %v2073_v5, %v2074_v7  ;;  %v1911_v10 = vmax.f32 %v1909_v41, %v1910_v8 }
 0xb08   :  { %2077 = vrot.lane.b32.xlu1 %v2075_v9, %s2861_s5  ;;  %1913 = vrot.lane.b32.xlu0 %v1911_v10, %s2861_s5 }
 0xb0c   :  { %2031 = vrot.lane.b32.xlu1 %v2510_v56, %s2860_s3  ;;  %2029 = vrot.lane.b32.xlu0 %v2507_v30, %s2860_s3 }
 0xb10   :  { %1929 = vperm.xlu1 %2601, %v2510_v56   ;;  %2091 = vperm.xlu0 %2603, %v2510_v56  }
 0xb14   :  { %2602 = vset.pattern.permute.xlu1 %v2859_v43  ;;  %2604 = vset.pattern.permute.xlu0 %v2858_v42 }
 0xb15   :  { %2087 = vperm.xlu1 %2602, %v2507_v30   ;;  %1924 = vperm.xlu0 %2604, %v2507_v30  }
 0xb19   :  { %2605 = vset.pattern.permute.xlu1 %v2858_v42 }
 0xb7a   :  { %v2078_v11 = vpop.permute.xlu1 %2077  ;;  %v1914_v12 = vpop.permute.xlu0 %1913 }
 0xb7b   :  { %v1916_v13 = vadd.f32 %v2507_v30, %v1914_v12  ;;  %v1917_v14 = vadd.f32 %v2510_v56, %v1914_v12  ;;  %v2080_v47 = vadd.f32 %v2507_v30, %v2078_v11  ;;  %v2081_v18 = vadd.f32 %v2510_v56, %v2078_v11 }
 0xb7d   :  { %v1918_v15 = vmul.f32 0.2, %v1916_v13  ;;  %v1919_v16 = vmul.f32 0.2, %v1917_v14  ;;  %v2082_v53 = vmul.f32 0.2, %v2080_v47 }
 0xb7e   :  { %v2083_v20 = vmul.f32 0.2, %v2081_v18  ;;  %v2030_v42 = vpop.permute.xlu0 %2029  ;;  %v2032_v23 = vpop.permute.xlu1 %2031 }
 0xb7f   :  { %v1920_v17 = vmax.f32 %v1916_v13, %v1918_v15  ;;  %v1921_v19 = vmax.f32 %v1917_v14, %v1919_v16  ;;  %v2084_v21 = vmax.f32 %v2080_v47, %v2082_v53  ;;  %v2864_v53 = vmov 0.0|0.0  }
 0xb80   :  { %v2085_v22 = vmax.f32 %v2081_v18, %v2083_v20 }
 0xb81   :  { %1944 = vperm.xlu1 %2605, %v1920_v17   ;;  %1949 = vperm.xlu0 %2604, %v1921_v19  }
 0xb85   :  { %2606 = vset.pattern.permute.xlu1 %v2859_v43 }
 0xb86   :  { %2106 = vperm.xlu1 %2606, %v2084_v21  }
 0xb8a   :  { %2111 = vperm.xlu1 %2606, %v2085_v22   ;;  %v2432_v22 = vld [vmem:[%s3390_s12] ss:$0 sm:$0xff] }
 0xb8f   :  { %v2092_v25 = vpop.permute.xlu0 %2091  ;;  %v1930_v28 = vpop.permute.xlu1 %1929 }
 0xb94   :  { %v1925_v26 = vpop.permute.xlu0 %1924  ;;  %v2088_v29 = vpop.permute.xlu1 %2087 }
 0xb9f   :  { %1871 = vxpose.xlu0.b32.start [1/2] (short) (narrow) %v2507_v30, 8 }
 0xba3   :  { %1872 = vxpose.xlu0.b32.end [2/2] (short) (narrow) %v2510_v56, 8 }
 0xbb3   :  { %2035 = vxpose.xlu1.b32.start [1/2] (short) (narrow) %v2030_v42, 8  ;;  %v2435_v42 = vld [vmem:[%s3390_s12 + $0x1] ss:$0 sm:$0xff]  ;;  %s2865_s12 = smov [#allocation5]  }
 0xbb4   :  { %s2279_s15 = sshll.u32 %s2865_s12, 4  ;;  %s2280_s15 = int_to_ptr.vmem [resolvable:$true] %s2279_s15 }
 0xbb5   :  { %s2827_s16 = scalar_lea.vmem %s2280_s15, 128  ;;  %p2832_p9 = scmp.lt.s32.totalorder %s2280_s15, %s2280_s15 }
 0xbb6   :  { %p2828_p8 = scmp.ne.s32.totalorder %s2280_s15, %s2827_s16  ;;  %p2833_p10 = scmp.lt.s32.totalorder %s2827_s16, %s2827_s16 }
 0xbb7   :  { %2036 = vxpose.xlu1.b32.end [2/2] (short) (narrow) %v2032_v23, 8 }
 0xbb8   :  { %p2834_p11 = por %p2833_p10, %p2832_p9 }
 0xbba   :  { %p2835_p12 = pnand %p2834_p11, %p2828_p8 }
 0xbcc   :  { %2607 = vset.pattern.permute.xlu0 %v2863_v6 }
 0xbd5   :  { %2608 = vset.pattern.permute.xlu1 %v2863_v6 }
 0xc00   :  { %v1950_v0 = vpop.permute.xlu0 %1949  ;;  %v1945_v33 = vpop.permute.xlu1 %1944 }
 0xc05   :  { %v2107_v40 = vpop.permute.xlu1 %2106 }
 0xc09   :  { %v2112_v48 = vpop.permute.xlu1 %2111 }
 0xc1f   :  { %v1887_v31 = vpop.trf.xlu0 }
 0xc20   :  { %v1935_v43 = vrot.slane %v1887_v31, %v3007_v27 }
 0xc22   :  { %v1936_v34 = vadd.f32 %v1935_v43, %v1925_v26  ;;  %v1937_v35 = vadd.f32 %v1935_v43, %v1930_v28 }
 0xc24   :  { %v1938_v36 = vmul.f32 0.2, %v1936_v34  ;;  %v1939_v37 = vmul.f32 0.2, %v1937_v35 }
 0xc26   :  { %v1940_v38 = vmax.f32 %v1936_v34, %v1938_v36  ;;  %v1941_v39 = vmax.f32 %v1937_v35, %v1939_v37 }
 0xc28   :  { %v1952_v44 = vsub.f32 %v1940_v38, %v1945_v33  ;;  %v1953_v45 = vsub.f32 %v1941_v39, %v1950_v0  ;;  %v2198_v39 = vld [vmem:[%s3380_s2] sm:$0xff] }
 0xc2a   :  { %v1954_v46 = vmul.f32 1.442695, %v1952_v44  ;;  %v1956_v6 = vmul.f32 1.442695, %v1953_v45 }
 0xc2c   :  { %2788 = vpow2.f32 %v1954_v46 }
 0xc2d   :  { %2790 = vpow2.f32 %v1956_v6 }
 0xc33   :  { %v2051_v49 = vpop.trf.xlu1 }
 0xc34   :  { %v2097_v51 = vrot.slane %v2051_v49, %v3007_v27 }
 0xc36   :  { %v2098_v52 = vadd.f32 %v2097_v51, %v2088_v29  ;;  %v2099_v30 = vadd.f32 %v2097_v51, %v2092_v25  ;;  %v2789_v54 = vpop.eup %2788 }
 0xc37   :  { %v2791_v55 = vpop.eup %2790 }
 0xc38   :  { %v2100_v56 = vmul.f32 0.2, %v2098_v52  ;;  %v2101_v32 = vmul.f32 0.2, %v2099_v30  ;;  %v1958_v57 = vpack.c.bf16 %v2791_v55, %v2789_v54 }
 0xc3a   :  { %v2102_v58 = vmax.f32 %v2098_v52, %v2100_v56  ;;  %v2103_v59 = vmax.f32 %v2099_v30, %v2101_v32  ;;  %v1959_v61 = vmul.bf16 %v2804_v60, %v1958_v57 }
 0xc3c   :  { %v2114_v62 = vsub.f32 %v2102_v58, %v2107_v40  ;;  %v2115_v63 = vsub.f32 %v2103_v59, %v2112_v48  ;;  %2545 = vmatmul.mubr.msk.bf16.vlgmr.msra.gmra.mrb[20].mxu0 %vm404_vm5, %v1959_v61 }
 0xc3d   :  { %2549 = vmatpush3.bf16.msra.mxu0 %v3324_v50  ;;  %2550 = vmatprep.mubr.msk.bf16.mxu0 %vm2862_vm4, %v2857_v24 }
 0xc3e   :  { %v2116_v1 = vmul.f32 1.442695, %v2114_v62  ;;  %v2118_v27 = vmul.f32 1.442695, %v2115_v63  ;;  %2561 = vmatprep.subr.bf16.mxu0 %v2864_v53 }
 0xc40   :  { %2792 = vpow2.f32 %v2116_v1 }
 0xc41   :  { %2794 = vpow2.f32 %v2118_v27 }
 0xc4a   :  { %v2793_v2 = vpop.eup %2792 }
 0xc4b   :  { %v2795_v3 = vpop.eup %2794 }
 0xc4c   :  { %v2120_v4 = vpack.c.bf16 %v2795_v3, %v2793_v2 }
 0xc4e   :  { %v2121_v5 = vmul.bf16 %v2804_v60, %v2120_v4 }
 0xc50   :  { %2551 = vmatmul.mubr.msk.bf16.vlgmr.msra.gmra.mrb[24].mxu0 %vm404_vm5, %v2121_v5 }
 0xc51   :  { %2558 = vmatprep.mubr.msk.f32.mxu0 %vm2862_vm4, %v2857_v24 }
 0xd0f   :  { %v1997_v41 = vpop.f32.mrb[20].mxu0 }
 0xd10   :  { %v2004_v7 = vmax.f32 %v1997_v41, 1e-09  ;;  %v2546_v8 = vpop.f32.mrb[21].mxu0 }
 0xd11   :  { %v2000_v9 = vpop.f32.mrb[22].mxu0 }
 0xd12   :  { %2796 = vrcp.f32 %v2004_v7  ;;  %v2005_v50 = vmax.f32 %v2000_v9, 1e-09  ;;  %v2547_v10 = vpop.f32.mrb[23].mxu0 }
 0xd14   :  { %2798 = vrcp.f32 %v2005_v50 }
 0xd1c   :  { %v2797_v11 = vpop.eup %2796 }
 0xd1d   :  { %2010 = vperm.xlu0 %2607, %v2797_v11  }
 0xd1e   :  { %v2799_v12 = vpop.eup %2798 }
 0xd1f   :  { %2015 = vperm.xlu1 %2608, %v2799_v12  }
 0xd23   :  { %v2159_v13 = vpop.f32.mrb[24].mxu0 }
 0xd24   :  { %v2166_v14 = vmax.f32 %v2159_v13, 1e-09  ;;  %v2552_v47 = vpop.f32.mrb[25].mxu0 }
 0xd25   :  { %v2162_v15 = vpop.f32.mrb[26].mxu0 }
 0xd26   :  { %2800 = vrcp.f32 %v2166_v14  ;;  %v2167_v16 = vmax.f32 %v2162_v15, 1e-09  ;;  %v2553_v17 = vpop.f32.mrb[27].mxu0 }
 0xd28   :  { %2802 = vrcp.f32 %v2167_v16 }
 0xd30   :  { %v2801_v24 = vpop.eup %2800 }
 0xd31   :  { %2172 = vperm.xlu0 %2607, %v2801_v24  }
 0xd32   :  { %v2803_v18 = vpop.eup %2802 }
 0xd33   :  { %2177 = vperm.xlu1 %2608, %v2803_v18  }
 0xd9c   :  { %v2011_v19 = vpop.permute.xlu0 %2010 }
 0xd9d   :  { %v2018_v21 = vmul.f32 %v2011_v19, %v1997_v41 }
 0xd9e   :  { %v2016_v20 = vpop.permute.xlu1 %2015 }
 0xd9f   :  { %v2019_v25 = vmul.f32 %v2016_v20, %v2000_v9  ;;  %v2027_v0 = vadd.f32 %v2432_v22, %v2018_v21 }
 0xda1   :  { %v2028_v43 = vadd.f32 %v2432_v22, %v2019_v25 }
 0xdb0   :  { %v2173_v23 = vpop.permute.xlu0 %2172 }
 0xdb1   :  { %v2180_v26 = vmul.f32 %v2173_v23, %v2159_v13 }
 0xdb2   :  { %v2178_v28 = vpop.permute.xlu1 %2177 }
 0xdb3   :  { %v2190_v29 = vadd.f32 %v2435_v42, %v2180_v26  ;;  %v2181_v31 = vmul.f32 %v2178_v28, %v2162_v15 }
 0xdb5   :  { %v2194_v33 = vadd.f32 %v2190_v29, %v2027_v0  ;;  %v2191_v34 = vadd.f32 %v2435_v42, %v2181_v31 }
 0xdb7   :  { %v2195_v35 = vadd.f32 %v2191_v34, %v2028_v43  ;;  %v2196_v36 = vmul.f32 0.5, %v2194_v33 }
 0xdb9   :  { %v2197_v37 = vmul.f32 0.5, %v2195_v35 }
 0xdbb   :  { %v2562_v38 = vpack.c.bf16 %v2197_v37, %v2196_v36 }
 0xdbd   :  { %2563 = vmatpush3.bf16.msra.mxu0 %v2562_v38 }
 0xdc0   :  { %2559 = vmatmul.mubr.msk.f32.vlgmr.msra.gmra.mrb[28].mxu0 %vm404_vm5, %v2198_v39 }
 0xe93   :  { %v2268_v40 = vpop.f32.mrb[28].mxu0 }
 0xe94   :  { %2272 = vst [vmem:[#allocation5] sm:$0xff] %v2268_v40  ;;  %v2560_v44 = vpop.f32.mrb[29].mxu0 }
 0xe95   :  { %2838 = shalt.err (!%p2835_p12)
}
 0xe96   :  { %s2839_s19 = scalar_lea.hbm %s3391_s13, 128 }
 0xe97   :  { %p2840_p13 = scmp.ne.s32.totalorder %s3391_s13, %s2839_s19  ;;  %p2843_p0 = scmp.lt.u32.totalorder %s2839_s19, %s3391_s13 }
 0xe99   :  { %p2845_p1 = pnand %p2843_p0, %p2840_p13 }
 0xe9b   :  { %2848 = shalt.err (!%p2845_p1)
}
 0xe9c   :  { %2282 = dma.vmem_to_hbm [thread:$0]  %s2280_s15, 128, %s3391_s13, [#allocation4]  }
 0xe9d   :  { %2851 = dma.done.wait [#allocation4], 128  }
 0xe9e   :  { %2852 = vsyncadd [#allocation4], 4294967168 }
 0xe9f   :  { %2286 = vsyncpa [#allocation3], 1 }
 0xea0   :  { %2287 = vsyncpa [#allocation4], 1 }

</bundles_post_ra>
